<compile_context>
chip_gen: v5e
topology: v5e:2x2
jax: 0.10.0
libtpu: 0.0.40
codegen_flags: <defaults>
</compile_context>

<pallas_src>
import functools

import jax
import jax.numpy as jnp
from jax.experimental import pallas as pl
from jax.experimental.pallas import tpu as pltpu


# ----------------------------------------------------------------------------
# Fused bidirectional GImodel + merge_ret kernel (single invocation, no grid).
#   tgt_ref    : [B, T, D]  f32   target, original time order
#   maskp_ref  : [B, T, P]  f32   per-player mask (expanded to D in-kernel)
#   expand_ref : [P, D]     bf16  exact 0/1 repeat_interleave matrix
#   wx_ref     : [D, 2H]    bf16  [Wx_f | Wx_b]
#   b_ref      : [1, 2H]    f32   [b_f  | b_b ]
#   wh_ref     : [2H, 2H]   bf16  block_diag(Wh_f, Wh_b)
#   wo_ref     : [2H, 2D]   bf16  block_diag(Wo_f, Wo_b)
#   bo_ref     : [1, 2D]    f32   [bo_f | bo_b]
#   pred_ref   : [B, T, D]  f32   merged prediction (merge_ret output)
# ----------------------------------------------------------------------------
def gi_bidir_kernel(tgt_ref, maskp_ref, expand_ref, wx_ref, b_ref, wh_ref,
                    wo_ref, bo_ref, pred_ref, *, weighted: bool):
    B, T, D = tgt_ref.shape
    H2 = wh_ref.shape[0]
    H = H2 // 2
    P = maskp_ref.shape[-1]

    # --- in-kernel mask expansion (repeat_interleave by 6) via an exact 0/1 matmul.
    m = jnp.dot(maskp_ref[...].reshape(B * T, P).astype(jnp.bfloat16),
                expand_ref[...],
                preferred_element_type=jnp.float32).reshape(B, T, D)

    x_in = tgt_ref[...] * m                       # ret['input'] = target * mask

    # --- hoisted input projection for BOTH directions: one bulk MXU pass.
    xp = jnp.dot(x_in.reshape(B * T, D).astype(jnp.bfloat16), wx_ref[...],
                 preferred_element_type=jnp.float32) + b_ref[...]
    xp = xp.reshape(B, T, H2)

    # Per-step drive terms precomputed OFF the serial chain.
    #   cols [:H]  -> forward chain, original time t
    #   cols [H:]  -> backward chain, reversed step t (== original time T-1-t)
    xp_steps = [
        jnp.concatenate([xp[:, t, :H], xp[:, T - 1 - t, H:]], axis=-1)
        for t in range(T)
    ]

    wh = wh_ref[...]                              # block-diag: both chains fused

    # --- fused dual-direction recurrence: fully unrolled, ONE matmul + tanh per
    #     step; hidden history stays in registers (no per-step scratch traffic).
    h = jnp.zeros((B, H2), jnp.bfloat16)
    h_hist = []
    for t in range(T):
        pre = xp_steps[t] + jnp.dot(h, wh, preferred_element_type=jnp.float32)
        h_f32 = jnp.tanh(pre)                     # f32 on the EUP
        h = h_f32.astype(jnp.bfloat16)            # bf16 only as next MXU operand
        h_hist.append(h_f32)                      # keep f32; bulk-cast once below

    # --- restitch so BOTH halves sit in ORIGINAL time order, single readout pass.
    h_rows = [
        jnp.concatenate([h_hist[t][:, :H], h_hist[T - 1 - t][:, H:]], axis=-1)
        for t in range(T)
    ]
    h_all = jnp.stack(h_rows, axis=1)             # [B, T, 2H] f32, original frame

    y = jnp.dot(h_all.reshape(B * T, H2).astype(jnp.bfloat16), wo_ref[...],
                preferred_element_type=jnp.float32) + bo_ref[...]
    y = y.reshape(B, T, 2 * D)
    y_f = y[:, :, :D]                             # forward readout  (orig frame)
    y_b = y[:, :, D:]                             # backward readout (orig frame)

    keep = 1.0 - m                                # mask is binary: m*x_in == x_in
    pred_f = x_in + keep * y_f                    # gi_f prediction, original frame
    pred_b = x_in + keep * y_b                    # gi_b prediction, original frame

    # --- merge_ret: torch uses the backward pred WITHOUT flipping it back, i.e.
    #     out[t] = w[t]*pred_f[t] + w[T-1-t]*pred_b_origframe[T-1-t].
    #     Weights are static Python floats -> scalar constants, no iota needed.
    rows = []
    for t in range(T):
        w_fwd = (t + 1) / T if weighted else 0.5
        w_bwd = (T - t) / T if weighted else 0.5
        rows.append(w_fwd * pred_f[:, t:t + 1, :]
                    + w_bwd * pred_b[:, T - 1 - t:T - t, :])
    pred_ref[...] = jnp.concatenate(rows, axis=1)


def _block_diag(a, b):
    ra, ca = a.shape
    rb, cb = b.shape
    out = jnp.zeros((ra + rb, ca + cb), jnp.float32)
    return out.at[:ra, :ca].set(a).at[ra:, cb * 0 + ca:].set(b)


def run_graph_imputer_kernel(target, mask_player, weights_f, weights_b, *,
                             n_feat, weighted):
    """One pallas_call computing the merged GraphImputer prediction [B, T, D]."""
    B, T, D = target.shape
    P = mask_player.shape[-1]

    # Pack both directions' weights so the kernel does fused dual-chain math.
    expand = jnp.repeat(jnp.eye(P, dtype=jnp.float32), n_feat,
                        axis=1).astype(jnp.bfloat16)                       # [P, D]
    wx_cat = jnp.concatenate([weights_f["wx"], weights_b["wx"]],
                             axis=1).astype(jnp.bfloat16)                  # [D, 2H]
    b_cat = jnp.concatenate([weights_f["b"], weights_b["b"]],
                            axis=-1).astype(jnp.float32)                   # [1, 2H]
    wh_blk = _block_diag(weights_f["wh"], weights_b["wh"]).astype(jnp.bfloat16)
    wo_blk = _block_diag(weights_f["wo"], weights_b["wo"]).astype(jnp.bfloat16)
    bo_cat = jnp.concatenate([weights_f["bo"], weights_b["bo"]],
                             axis=-1).astype(jnp.float32)                  # [1, 2D]

    vmem = pl.BlockSpec(memory_space=pltpu.MemorySpace.VMEM)
    return pl.pallas_call(
        functools.partial(gi_bidir_kernel, weighted=weighted),
        out_shape=jax.ShapeDtypeStruct((B, T, D), jnp.float32),
        in_specs=[vmem] * 8,
        out_specs=vmem,
    )(target, mask_player.astype(jnp.float32), expand, wx_cat, b_cat,
      wh_blk, wo_blk, bo_cat)


# ----------------------------------------------------------------------------
# GraphImputer.forward
# ----------------------------------------------------------------------------
@functools.partial(jax.jit, static_argnames=("n_players", "n_feat", "weighted"))
def graph_imputer_forward(player_data, mask_player, weights_f, weights_b, *,
                          n_players, n_feat=6, weighted=True):
    B, T, D = player_data.shape
    assert D == n_players * n_feat
    mask_player = mask_player.astype(jnp.float32)

    # Fused forward+backward GImodel + merge_ret in ONE kernel.
    pred = run_graph_imputer_kernel(player_data, mask_player, weights_f,
                                    weights_b, n_feat=n_feat, weighted=weighted)

    # Returned alongside pred (as in the torch module); tiny, plain XLA.
    mask6 = jnp.repeat(mask_player, n_feat, axis=-1)

    # calc_pos_error (aggfunc='mean'): Euclidean (x, y) error over missing entries.
    diff = (pred - player_data).reshape(B, T, n_players, n_feat)
    dist = jnp.sqrt(jnp.sum(diff[..., :2] ** 2, axis=-1))        # [B, T, P]
    miss = 1.0 - mask_player                                     # 1 where missing
    # NB: denominator clamped to 1 when nothing is missing (torch 'mean' would NaN).
    pred_pe = jnp.sum(dist * miss) / jnp.maximum(jnp.sum(miss), 1.0)

    # TODO(synk): ret['total_loss'] (GImodel VRNN loss / KLD) is unspecified upstream.
    return {
        "pred": pred,
        "target": player_data,
        "mask": mask6,
        "input": player_data * mask6,
        "pred_pe": pred_pe,
    }


def init_gimodel_weights(key, d_in, hidden):
    k1, k2, k3, _ = jax.random.split(key, 4)
    s = 0.1
    return {
        "wx": s * jax.random.normal(k1, (d_in, hidden), jnp.float32),
        "wh": s * jax.random.normal(k2, (hidden, hidden), jnp.float32),
        "b": jnp.zeros((1, hidden), jnp.float32),
        "wo": s * jax.random.normal(k3, (hidden, d_in), jnp.float32),
        "bo": jnp.zeros((1, d_in), jnp.float32),
    }


def _reference_pred(player_data, mask_player, weights_f, weights_b, *,
                    n_feat, weighted):
    """Pure-JAX f32 reference of the merged prediction (guards frame bookkeeping)."""
    B, T, D = player_data.shape
    m = jnp.repeat(mask_player, n_feat, axis=-1)
    x = player_data * m

    def one_direction(x_d, m_d, w):
        xp = jnp.einsum("btd,dh->bth", x_d, w["wx"]) + w["b"]
        h = jnp.zeros((B, w["wh"].shape[0]), jnp.float32)
        hs = []
        for t in range(T):
            h = jnp.tanh(xp[:, t] + h @ w["wh"])
            hs.append(h)
        hseq = jnp.stack(hs, axis=1)
        y = jnp.einsum("bth,hd->btd", hseq, w["wo"]) + w["bo"]
        return x_d + (1.0 - m_d) * y

    pred_f = one_direction(x, m, weights_f)
    pred_b = one_direction(jnp.flip(x, 1), jnp.flip(m, 1), weights_b)  # rev frame
    if weighted:
        w_t = (jnp.arange(1, T + 1, dtype=jnp.float32) / T).reshape(1, T, 1)
        return pred_f * w_t + pred_b * jnp.flip(w_t, 1)     # torch: no flip-back
    return 0.5 * pred_f + 0.5 * pred_b


if __name__ == "__main__":
    # params surrogate: single_team=True, team_size=4, 6 feats/player, rnn_dim=32.
    B, T, P, F, H = 2, 16, 4, 6, 32
    D = P * F

    key = jax.random.PRNGKey(0)
    k_data, k_mask, k_wf, k_wb = jax.random.split(key, 4)

    player_data = jax.random.normal(k_data, (B, T, D), jnp.float32)
    # generate_mask surrogate: 1 = observed, 0 = missing (per player per frame).
    mask_player = (jax.random.uniform(k_mask, (B, T, P)) > 0.5).astype(jnp.float32)

    weights_f = init_gimodel_weights(k_wf, D, H)   # gi_f
    weights_b = init_gimodel_weights(k_wb, D, H)   # gi_b

    out = graph_imputer_forward(player_data, mask_player, weights_f, weights_b,
                                n_players=P, n_feat=F, weighted=True)
    jax.block_until_ready(out)

    assert out["pred"].shape == (B, T, D)
    assert out["mask"].shape == (B, T, D)
    assert out["input"].shape == (B, T, D)
    assert out["pred_pe"].shape == ()
    assert bool(jnp.isfinite(out["pred_pe"]))

    # Guard the reverse/merge frame bookkeeping against a pure-JAX f32 reference
    # (bf16 MXU operands + bf16 hidden state give small numeric drift only).
    ref = _reference_pred(player_data, mask_player, weights_f, weights_b,
                          n_feat=F, weighted=True)
    assert float(jnp.max(jnp.abs(out["pred"] - ref))) < 5e-2

    print("KERNEL_OK")
</pallas_src>

<mosaic_0001>
module attributes {stable_mosaic.version = 11 : i64} {
  func.func @gi_bidir_kernel(%arg0: memref<2x16x24xf32, #tpu.memory_space<vmem>>, %arg1: memref<2x16x4xf32, #tpu.memory_space<vmem>>, %arg2: memref<4x24xbf16, #tpu.memory_space<vmem>>, %arg3: memref<24x64xbf16, #tpu.memory_space<vmem>>, %arg4: memref<1x64xf32, #tpu.memory_space<vmem>>, %arg5: memref<64x64xbf16, #tpu.memory_space<vmem>>, %arg6: memref<64x48xbf16, #tpu.memory_space<vmem>>, %arg7: memref<1x48xf32, #tpu.memory_space<vmem>>, %arg8: memref<2x16x24xf32, #tpu.memory_space<vmem>>) attributes {dimension_semantics = [], scalar_prefetch = 0 : i64, scratch_operands = 0 : i64, tpu.core_type = #tpu.core_type<tc>} {
    %c0 = arith.constant 0 : index
    %c0_0 = arith.constant 0 : index
    %c0_1 = arith.constant 0 : index
    %0 = vector.load %arg1[%c0, %c0_0, %c0_1] : memref<2x16x4xf32, #tpu.memory_space<vmem>>, vector<2x16x4xf32>
    %1 = vector.shape_cast %0 : vector<2x16x4xf32> to vector<32x4xf32>
    %2 = arith.truncf %1 : vector<32x4xf32> to vector<32x4xbf16>
    %c0_2 = arith.constant 0 : index
    %c0_3 = arith.constant 0 : index
    %3 = vector.load %arg2[%c0_2, %c0_3] : memref<4x24xbf16, #tpu.memory_space<vmem>>, vector<4x24xbf16>
    %cst = arith.constant dense<0.000000e+00> : vector<32x24xf32>
    %4 = tpu.matmul %2, %3, %cst {dimension_numbers = #tpu.dot_dimension_numbers<[1], [0], [0], [1], [0, 0, 1, 1], [], []>} : vector<32x4xbf16>, vector<4x24xbf16>, vector<32x24xf32> -> vector<32x24xf32>
    %5 = vector.shape_cast %4 : vector<32x24xf32> to vector<2x16x24xf32>
    %c0_4 = arith.constant 0 : index
    %c0_5 = arith.constant 0 : index
    %c0_6 = arith.constant 0 : index
    %6 = vector.load %arg0[%c0_4, %c0_5, %c0_6] : memref<2x16x24xf32, #tpu.memory_space<vmem>>, vector<2x16x24xf32>
    %7 = arith.mulf %6, %5 : vector<2x16x24xf32>
    %8 = vector.shape_cast %7 : vector<2x16x24xf32> to vector<32x24xf32>
    %9 = arith.truncf %8 : vector<32x24xf32> to vector<32x24xbf16>
    %c0_7 = arith.constant 0 : index
    %c0_8 = arith.constant 0 : index
    %10 = vector.load %arg3[%c0_7, %c0_8] : memref<24x64xbf16, #tpu.memory_space<vmem>>, vector<24x64xbf16>
    %cst_9 = arith.constant dense<0.000000e+00> : vector<32x64xf32>
    %11 = tpu.matmul %9, %10, %cst_9 {dimension_numbers = #tpu.dot_dimension_numbers<[1], [0], [0], [1], [0, 0, 1, 1], [], []>} : vector<32x24xbf16>, vector<24x64xbf16>, vector<32x64xf32> -> vector<32x64xf32>
    %c0_10 = arith.constant 0 : index
    %c0_11 = arith.constant 0 : index
    %12 = vector.load %arg4[%c0_10, %c0_11] : memref<1x64xf32, #tpu.memory_space<vmem>>, vector<1x64xf32>
    %13 = vector.broadcast %12 : vector<1x64xf32> to vector<32x64xf32>
    %14 = arith.addf %11, %13 : vector<32x64xf32>
    %15 = vector.shape_cast %14 : vector<32x64xf32> to vector<2x16x64xf32>
    %16 = vector.extract_strided_slice %15 {offsets = [0, 0, 0], sizes = [2, 1, 32], strides = [1, 1, 1]} : vector<2x16x64xf32> to vector<2x1x32xf32>
    %17 = vector.shape_cast %16 : vector<2x1x32xf32> to vector<2x32xf32>
    %18 = vector.extract_strided_slice %15 {offsets = [0, 15, 32], sizes = [2, 1, 32], strides = [1, 1, 1]} : vector<2x16x64xf32> to vector<2x1x32xf32>
    %19 = vector.shape_cast %18 : vector<2x1x32xf32> to vector<2x32xf32>
    %20 = tpu.concatenate %17, %19 in 1 : vector<2x32xf32>, vector<2x32xf32> -> vector<2x64xf32>
    %21 = vector.extract_strided_slice %15 {offsets = [0, 1, 0], sizes = [2, 1, 32], strides = [1, 1, 1]} : vector<2x16x64xf32> to vector<2x1x32xf32>
    %22 = vector.shape_cast %21 : vector<2x1x32xf32> to vector<2x32xf32>
    %23 = vector.extract_strided_slice %15 {offsets = [0, 14, 32], sizes = [2, 1, 32], strides = [1, 1, 1]} : vector<2x16x64xf32> to vector<2x1x32xf32>
    %24 = vector.shape_cast %23 : vector<2x1x32xf32> to vector<2x32xf32>
    %25 = tpu.concatenate %22, %24 in 1 : vector<2x32xf32>, vector<2x32xf32> -> vector<2x64xf32>
    %26 = vector.extract_strided_slice %15 {offsets = [0, 2, 0], sizes = [2, 1, 32], strides = [1, 1, 1]} : vector<2x16x64xf32> to vector<2x1x32xf32>
    %27 = vector.shape_cast %26 : vector<2x1x32xf32> to vector<2x32xf32>
    %28 = vector.extract_strided_slice %15 {offsets = [0, 13, 32], sizes = [2, 1, 32], strides = [1, 1, 1]} : vector<2x16x64xf32> to vector<2x1x32xf32>
    %29 = vector.shape_cast %28 : vector<2x1x32xf32> to vector<2x32xf32>
    %30 = tpu.concatenate %27, %29 in 1 : vector<2x32xf32>, vector<2x32xf32> -> vector<2x64xf32>
    %31 = vector.extract_strided_slice %15 {offsets = [0, 3, 0], sizes = [2, 1, 32], strides = [1, 1, 1]} : vector<2x16x64xf32> to vector<2x1x32xf32>
    %32 = vector.shape_cast %31 : vector<2x1x32xf32> to vector<2x32xf32>
    %33 = vector.extract_strided_slice %15 {offsets = [0, 12, 32], sizes = [2, 1, 32], strides = [1, 1, 1]} : vector<2x16x64xf32> to vector<2x1x32xf32>
    %34 = vector.shape_cast %33 : vector<2x1x32xf32> to vector<2x32xf32>
    %35 = tpu.concatenate %32, %34 in 1 : vector<2x32xf32>, vector<2x32xf32> -> vector<2x64xf32>
    %36 = vector.extract_strided_slice %15 {offsets = [0, 4, 0], sizes = [2, 1, 32], strides = [1, 1, 1]} : vector<2x16x64xf32> to vector<2x1x32xf32>
    %37 = vector.shape_cast %36 : vector<2x1x32xf32> to vector<2x32xf32>
    %38 = vector.extract_strided_slice %15 {offsets = [0, 11, 32], sizes = [2, 1, 32], strides = [1, 1, 1]} : vector<2x16x64xf32> to vector<2x1x32xf32>
    %39 = vector.shape_cast %38 : vector<2x1x32xf32> to vector<2x32xf32>
    %40 = tpu.concatenate %37, %39 in 1 : vector<2x32xf32>, vector<2x32xf32> -> vector<2x64xf32>
    %41 = vector.extract_strided_slice %15 {offsets = [0, 5, 0], sizes = [2, 1, 32], strides = [1, 1, 1]} : vector<2x16x64xf32> to vector<2x1x32xf32>
    %42 = vector.shape_cast %41 : vector<2x1x32xf32> to vector<2x32xf32>
    %43 = vector.extract_strided_slice %15 {offsets = [0, 10, 32], sizes = [2, 1, 32], strides = [1, 1, 1]} : vector<2x16x64xf32> to vector<2x1x32xf32>
    %44 = vector.shape_cast %43 : vector<2x1x32xf32> to vector<2x32xf32>
    %45 = tpu.concatenate %42, %44 in 1 : vector<2x32xf32>, vector<2x32xf32> -> vector<2x64xf32>
    %46 = vector.extract_strided_slice %15 {offsets = [0, 6, 0], sizes = [2, 1, 32], strides = [1, 1, 1]} : vector<2x16x64xf32> to vector<2x1x32xf32>
    %47 = vector.shape_cast %46 : vector<2x1x32xf32> to vector<2x32xf32>
    %48 = vector.extract_strided_slice %15 {offsets = [0, 9, 32], sizes = [2, 1, 32], strides = [1, 1, 1]} : vector<2x16x64xf32> to vector<2x1x32xf32>
    %49 = vector.shape_cast %48 : vector<2x1x32xf32> to vector<2x32xf32>
    %50 = tpu.concatenate %47, %49 in 1 : vector<2x32xf32>, vector<2x32xf32> -> vector<2x64xf32>
    %51 = vector.extract_strided_slice %15 {offsets = [0, 7, 0], sizes = [2, 1, 32], strides = [1, 1, 1]} : vector<2x16x64xf32> to vector<2x1x32xf32>
    %52 = vector.shape_cast %51 : vector<2x1x32xf32> to vector<2x32xf32>
    %53 = vector.extract_strided_slice %15 {offsets = [0, 8, 32], sizes = [2, 1, 32], strides = [1, 1, 1]} : vector<2x16x64xf32> to vector<2x1x32xf32>
    %54 = vector.shape_cast %53 : vector<2x1x32xf32> to vector<2x32xf32>
    %55 = tpu.concatenate %52, %54 in 1 : vector<2x32xf32>, vector<2x32xf32> -> vector<2x64xf32>
    %56 = vector.extract_strided_slice %15 {offsets = [0, 8, 0], sizes = [2, 1, 32], strides = [1, 1, 1]} : vector<2x16x64xf32> to vector<2x1x32xf32>
    %57 = vector.shape_cast %56 : vector<2x1x32xf32> to vector<2x32xf32>
    %58 = vector.extract_strided_slice %15 {offsets = [0, 7, 32], sizes = [2, 1, 32], strides = [1, 1, 1]} : vector<2x16x64xf32> to vector<2x1x32xf32>
    %59 = vector.shape_cast %58 : vector<2x1x32xf32> to vector<2x32xf32>
    %60 = tpu.concatenate %57, %59 in 1 : vector<2x32xf32>, vector<2x32xf32> -> vector<2x64xf32>
    %61 = vector.extract_strided_slice %15 {offsets = [0, 9, 0], sizes = [2, 1, 32], strides = [1, 1, 1]} : vector<2x16x64xf32> to vector<2x1x32xf32>
    %62 = vector.shape_cast %61 : vector<2x1x32xf32> to vector<2x32xf32>
    %63 = vector.extract_strided_slice %15 {offsets = [0, 6, 32], sizes = [2, 1, 32], strides = [1, 1, 1]} : vector<2x16x64xf32> to vector<2x1x32xf32>
    %64 = vector.shape_cast %63 : vector<2x1x32xf32> to vector<2x32xf32>
    %65 = tpu.concatenate %62, %64 in 1 : vector<2x32xf32>, vector<2x32xf32> -> vector<2x64xf32>
    %66 = vector.extract_strided_slice %15 {offsets = [0, 10, 0], sizes = [2, 1, 32], strides = [1, 1, 1]} : vector<2x16x64xf32> to vector<2x1x32xf32>
    %67 = vector.shape_cast %66 : vector<2x1x32xf32> to vector<2x32xf32>
    %68 = vector.extract_strided_slice %15 {offsets = [0, 5, 32], sizes = [2, 1, 32], strides = [1, 1, 1]} : vector<2x16x64xf32> to vector<2x1x32xf32>
    %69 = vector.shape_cast %68 : vector<2x1x32xf32> to vector<2x32xf32>
    %70 = tpu.concatenate %67, %69 in 1 : vector<2x32xf32>, vector<2x32xf32> -> vector<2x64xf32>
    %71 = vector.extract_strided_slice %15 {offsets = [0, 11, 0], sizes = [2, 1, 32], strides = [1, 1, 1]} : vector<2x16x64xf32> to vector<2x1x32xf32>
    %72 = vector.shape_cast %71 : vector<2x1x32xf32> to vector<2x32xf32>
    %73 = vector.extract_strided_slice %15 {offsets = [0, 4, 32], sizes = [2, 1, 32], strides = [1, 1, 1]} : vector<2x16x64xf32> to vector<2x1x32xf32>
    %74 = vector.shape_cast %73 : vector<2x1x32xf32> to vector<2x32xf32>
    %75 = tpu.concatenate %72, %74 in 1 : vector<2x32xf32>, vector<2x32xf32> -> vector<2x64xf32>
    %76 = vector.extract_strided_slice %15 {offsets = [0, 12, 0], sizes = [2, 1, 32], strides = [1, 1, 1]} : vector<2x16x64xf32> to vector<2x1x32xf32>
    %77 = vector.shape_cast %76 : vector<2x1x32xf32> to vector<2x32xf32>
    %78 = vector.extract_strided_slice %15 {offsets = [0, 3, 32], sizes = [2, 1, 32], strides = [1, 1, 1]} : vector<2x16x64xf32> to vector<2x1x32xf32>
    %79 = vector.shape_cast %78 : vector<2x1x32xf32> to vector<2x32xf32>
    %80 = tpu.concatenate %77, %79 in 1 : vector<2x32xf32>, vector<2x32xf32> -> vector<2x64xf32>
    %81 = vector.extract_strided_slice %15 {offsets = [0, 13, 0], sizes = [2, 1, 32], strides = [1, 1, 1]} : vector<2x16x64xf32> to vector<2x1x32xf32>
    %82 = vector.shape_cast %81 : vector<2x1x32xf32> to vector<2x32xf32>
    %83 = vector.extract_strided_slice %15 {offsets = [0, 2, 32], sizes = [2, 1, 32], strides = [1, 1, 1]} : vector<2x16x64xf32> to vector<2x1x32xf32>
    %84 = vector.shape_cast %83 : vector<2x1x32xf32> to vector<2x32xf32>
    %85 = tpu.concatenate %82, %84 in 1 : vector<2x32xf32>, vector<2x32xf32> -> vector<2x64xf32>
    %86 = vector.extract_strided_slice %15 {offsets = [0, 14, 0], sizes = [2, 1, 32], strides = [1, 1, 1]} : vector<2x16x64xf32> to vector<2x1x32xf32>
    %87 = vector.shape_cast %86 : vector<2x1x32xf32> to vector<2x32xf32>
    %88 = vector.extract_strided_slice %15 {offsets = [0, 1, 32], sizes = [2, 1, 32], strides = [1, 1, 1]} : vector<2x16x64xf32> to vector<2x1x32xf32>
    %89 = vector.shape_cast %88 : vector<2x1x32xf32> to vector<2x32xf32>
    %90 = tpu.concatenate %87, %89 in 1 : vector<2x32xf32>, vector<2x32xf32> -> vector<2x64xf32>
    %91 = vector.extract_strided_slice %15 {offsets = [0, 15, 0], sizes = [2, 1, 32], strides = [1, 1, 1]} : vector<2x16x64xf32> to vector<2x1x32xf32>
    %92 = vector.shape_cast %91 : vector<2x1x32xf32> to vector<2x32xf32>
    %93 = vector.extract_strided_slice %15 {offsets = [0, 0, 32], sizes = [2, 1, 32], strides = [1, 1, 1]} : vector<2x16x64xf32> to vector<2x1x32xf32>
    %94 = vector.shape_cast %93 : vector<2x1x32xf32> to vector<2x32xf32>
    %95 = tpu.concatenate %92, %94 in 1 : vector<2x32xf32>, vector<2x32xf32> -> vector<2x64xf32>
    %c0_12 = arith.constant 0 : index
    %c0_13 = arith.constant 0 : index
    %96 = vector.load %arg5[%c0_12, %c0_13] : memref<64x64xbf16, #tpu.memory_space<vmem>>, vector<64x64xbf16>
    %cst_14 = arith.constant 0.000000e+00 : bf16
    %97 = vector.broadcast %cst_14 : bf16 to vector<2x64xbf16>
    %cst_15 = arith.constant dense<0.000000e+00> : vector<2x64xf32>
    %98 = tpu.matmul %97, %96, %cst_15 {dimension_numbers = #tpu.dot_dimension_numbers<[1], [0], [0], [1], [0, 0, 1, 1], [], []>} : vector<2x64xbf16>, vector<64x64xbf16>, vector<2x64xf32> -> vector<2x64xf32>
    %99 = arith.addf %20, %98 : vector<2x64xf32>
    %100 = math.tanh %99 : vector<2x64xf32>
    %101 = arith.truncf %100 : vector<2x64xf32> to vector<2x64xbf16>
    %cst_16 = arith.constant dense<0.000000e+00> : vector<2x64xf32>
    %102 = tpu.matmul %101, %96, %cst_16 {dimension_numbers = #tpu.dot_dimension_numbers<[1], [0], [0], [1], [0, 0, 1, 1], [], []>} : vector<2x64xbf16>, vector<64x64xbf16>, vector<2x64xf32> -> vector<2x64xf32>
    %103 = arith.addf %25, %102 : vector<2x64xf32>
    %104 = math.tanh %103 : vector<2x64xf32>
    %105 = arith.truncf %104 : vector<2x64xf32> to vector<2x64xbf16>
    %cst_17 = arith.constant dense<0.000000e+00> : vector<2x64xf32>
    %106 = tpu.matmul %105, %96, %cst_17 {dimension_numbers = #tpu.dot_dimension_numbers<[1], [0], [0], [1], [0, 0, 1, 1], [], []>} : vector<2x64xbf16>, vector<64x64xbf16>, vector<2x64xf32> -> vector<2x64xf32>
    %107 = arith.addf %30, %106 : vector<2x64xf32>
    %108 = math.tanh %107 : vector<2x64xf32>
    %109 = arith.truncf %108 : vector<2x64xf32> to vector<2x64xbf16>
    %cst_18 = arith.constant dense<0.000000e+00> : vector<2x64xf32>
    %110 = tpu.matmul %109, %96, %cst_18 {dimension_numbers = #tpu.dot_dimension_numbers<[1], [0], [0], [1], [0, 0, 1, 1], [], []>} : vector<2x64xbf16>, vector<64x64xbf16>, vector<2x64xf32> -> vector<2x64xf32>
    %111 = arith.addf %35, %110 : vector<2x64xf32>
    %112 = math.tanh %111 : vector<2x64xf32>
    %113 = arith.truncf %112 : vector<2x64xf32> to vector<2x64xbf16>
    %cst_19 = arith.constant dense<0.000000e+00> : vector<2x64xf32>
    %114 = tpu.matmul %113, %96, %cst_19 {dimension_numbers = #tpu.dot_dimension_numbers<[1], [0], [0], [1], [0, 0, 1, 1], [], []>} : vector<2x64xbf16>, vector<64x64xbf16>, vector<2x64xf32> -> vector<2x64xf32>
    %115 = arith.addf %40, %114 : vector<2x64xf32>
    %116 = math.tanh %115 : vector<2x64xf32>
    %117 = arith.truncf %116 : vector<2x64xf32> to vector<2x64xbf16>
    %cst_20 = arith.constant dense<0.000000e+00> : vector<2x64xf32>
    %118 = tpu.matmul %117, %96, %cst_20 {dimension_numbers = #tpu.dot_dimension_numbers<[1], [0], [0], [1], [0, 0, 1, 1], [], []>} : vector<2x64xbf16>, vector<64x64xbf16>, vector<2x64xf32> -> vector<2x64xf32>
    %119 = arith.addf %45, %118 : vector<2x64xf32>
    %120 = math.tanh %119 : vector<2x64xf32>
    %121 = arith.truncf %120 : vector<2x64xf32> to vector<2x64xbf16>
    %cst_21 = arith.constant dense<0.000000e+00> : vector<2x64xf32>
    %122 = tpu.matmul %121, %96, %cst_21 {dimension_numbers = #tpu.dot_dimension_numbers<[1], [0], [0], [1], [0, 0, 1, 1], [], []>} : vector<2x64xbf16>, vector<64x64xbf16>, vector<2x64xf32> -> vector<2x64xf32>
    %123 = arith.addf %50, %122 : vector<2x64xf32>
    %124 = math.tanh %123 : vector<2x64xf32>
    %125 = arith.truncf %124 : vector<2x64xf32> to vector<2x64xbf16>
    %cst_22 = arith.constant dense<0.000000e+00> : vector<2x64xf32>
    %126 = tpu.matmul %125, %96, %cst_22 {dimension_numbers = #tpu.dot_dimension_numbers<[1], [0], [0], [1], [0, 0, 1, 1], [], []>} : vector<2x64xbf16>, vector<64x64xbf16>, vector<2x64xf32> -> vector<2x64xf32>
    %127 = arith.addf %55, %126 : vector<2x64xf32>
    %128 = math.tanh %127 : vector<2x64xf32>
    %129 = arith.truncf %128 : vector<2x64xf32> to vector<2x64xbf16>
    %cst_23 = arith.constant dense<0.000000e+00> : vector<2x64xf32>
    %130 = tpu.matmul %129, %96, %cst_23 {dimension_numbers = #tpu.dot_dimension_numbers<[1], [0], [0], [1], [0, 0, 1, 1], [], []>} : vector<2x64xbf16>, vector<64x64xbf16>, vector<2x64xf32> -> vector<2x64xf32>
    %131 = arith.addf %60, %130 : vector<2x64xf32>
    %132 = math.tanh %131 : vector<2x64xf32>
    %133 = arith.truncf %132 : vector<2x64xf32> to vector<2x64xbf16>
    %cst_24 = arith.constant dense<0.000000e+00> : vector<2x64xf32>
    %134 = tpu.matmul %133, %96, %cst_24 {dimension_numbers = #tpu.dot_dimension_numbers<[1], [0], [0], [1], [0, 0, 1, 1], [], []>} : vector<2x64xbf16>, vector<64x64xbf16>, vector<2x64xf32> -> vector<2x64xf32>
    %135 = arith.addf %65, %134 : vector<2x64xf32>
    %136 = math.tanh %135 : vector<2x64xf32>
    %137 = arith.truncf %136 : vector<2x64xf32> to vector<2x64xbf16>
    %cst_25 = arith.constant dense<0.000000e+00> : vector<2x64xf32>
    %138 = tpu.matmul %137, %96, %cst_25 {dimension_numbers = #tpu.dot_dimension_numbers<[1], [0], [0], [1], [0, 0, 1, 1], [], []>} : vector<2x64xbf16>, vector<64x64xbf16>, vector<2x64xf32> -> vector<2x64xf32>
    %139 = arith.addf %70, %138 : vector<2x64xf32>
    %140 = math.tanh %139 : vector<2x64xf32>
    %141 = arith.truncf %140 : vector<2x64xf32> to vector<2x64xbf16>
    %cst_26 = arith.constant dense<0.000000e+00> : vector<2x64xf32>
    %142 = tpu.matmul %141, %96, %cst_26 {dimension_numbers = #tpu.dot_dimension_numbers<[1], [0], [0], [1], [0, 0, 1, 1], [], []>} : vector<2x64xbf16>, vector<64x64xbf16>, vector<2x64xf32> -> vector<2x64xf32>
    %143 = arith.addf %75, %142 : vector<2x64xf32>
    %144 = math.tanh %143 : vector<2x64xf32>
    %145 = arith.truncf %144 : vector<2x64xf32> to vector<2x64xbf16>
    %cst_27 = arith.constant dense<0.000000e+00> : vector<2x64xf32>
    %146 = tpu.matmul %145, %96, %cst_27 {dimension_numbers = #tpu.dot_dimension_numbers<[1], [0], [0], [1], [0, 0, 1, 1], [], []>} : vector<2x64xbf16>, vector<64x64xbf16>, vector<2x64xf32> -> vector<2x64xf32>
    %147 = arith.addf %80, %146 : vector<2x64xf32>
    %148 = math.tanh %147 : vector<2x64xf32>
    %149 = arith.truncf %148 : vector<2x64xf32> to vector<2x64xbf16>
    %cst_28 = arith.constant dense<0.000000e+00> : vector<2x64xf32>
    %150 = tpu.matmul %149, %96, %cst_28 {dimension_numbers = #tpu.dot_dimension_numbers<[1], [0], [0], [1], [0, 0, 1, 1], [], []>} : vector<2x64xbf16>, vector<64x64xbf16>, vector<2x64xf32> -> vector<2x64xf32>
    %151 = arith.addf %85, %150 : vector<2x64xf32>
    %152 = math.tanh %151 : vector<2x64xf32>
    %153 = arith.truncf %152 : vector<2x64xf32> to vector<2x64xbf16>
    %cst_29 = arith.constant dense<0.000000e+00> : vector<2x64xf32>
    %154 = tpu.matmul %153, %96, %cst_29 {dimension_numbers = #tpu.dot_dimension_numbers<[1], [0], [0], [1], [0, 0, 1, 1], [], []>} : vector<2x64xbf16>, vector<64x64xbf16>, vector<2x64xf32> -> vector<2x64xf32>
    %155 = arith.addf %90, %154 : vector<2x64xf32>
    %156 = math.tanh %155 : vector<2x64xf32>
    %157 = arith.truncf %156 : vector<2x64xf32> to vector<2x64xbf16>
    %cst_30 = arith.constant dense<0.000000e+00> : vector<2x64xf32>
    %158 = tpu.matmul %157, %96, %cst_30 {dimension_numbers = #tpu.dot_dimension_numbers<[1], [0], [0], [1], [0, 0, 1, 1], [], []>} : vector<2x64xbf16>, vector<64x64xbf16>, vector<2x64xf32> -> vector<2x64xf32>
    %159 = arith.addf %95, %158 : vector<2x64xf32>
    %160 = math.tanh %159 : vector<2x64xf32>
    %161 = vector.extract_strided_slice %100 {offsets = [0, 0], sizes = [2, 32], strides = [1, 1]} : vector<2x64xf32> to vector<2x32xf32>
    %162 = vector.extract_strided_slice %160 {offsets = [0, 32], sizes = [2, 32], strides = [1, 1]} : vector<2x64xf32> to vector<2x32xf32>
    %163 = tpu.concatenate %161, %162 in 1 : vector<2x32xf32>, vector<2x32xf32> -> vector<2x64xf32>
    %164 = vector.extract_strided_slice %104 {offsets = [0, 0], sizes = [2, 32], strides = [1, 1]} : vector<2x64xf32> to vector<2x32xf32>
    %165 = vector.extract_strided_slice %156 {offsets = [0, 32], sizes = [2, 32], strides = [1, 1]} : vector<2x64xf32> to vector<2x32xf32>
    %166 = tpu.concatenate %164, %165 in 1 : vector<2x32xf32>, vector<2x32xf32> -> vector<2x64xf32>
    %167 = vector.extract_strided_slice %108 {offsets = [0, 0], sizes = [2, 32], strides = [1, 1]} : vector<2x64xf32> to vector<2x32xf32>
    %168 = vector.extract_strided_slice %152 {offsets = [0, 32], sizes = [2, 32], strides = [1, 1]} : vector<2x64xf32> to vector<2x32xf32>
    %169 = tpu.concatenate %167, %168 in 1 : vector<2x32xf32>, vector<2x32xf32> -> vector<2x64xf32>
    %170 = vector.extract_strided_slice %112 {offsets = [0, 0], sizes = [2, 32], strides = [1, 1]} : vector<2x64xf32> to vector<2x32xf32>
    %171 = vector.extract_strided_slice %148 {offsets = [0, 32], sizes = [2, 32], strides = [1, 1]} : vector<2x64xf32> to vector<2x32xf32>
    %172 = tpu.concatenate %170, %171 in 1 : vector<2x32xf32>, vector<2x32xf32> -> vector<2x64xf32>
    %173 = vector.extract_strided_slice %116 {offsets = [0, 0], sizes = [2, 32], strides = [1, 1]} : vector<2x64xf32> to vector<2x32xf32>
    %174 = vector.extract_strided_slice %144 {offsets = [0, 32], sizes = [2, 32], strides = [1, 1]} : vector<2x64xf32> to vector<2x32xf32>
    %175 = tpu.concatenate %173, %174 in 1 : vector<2x32xf32>, vector<2x32xf32> -> vector<2x64xf32>
    %176 = vector.extract_strided_slice %120 {offsets = [0, 0], sizes = [2, 32], strides = [1, 1]} : vector<2x64xf32> to vector<2x32xf32>
    %177 = vector.extract_strided_slice %140 {offsets = [0, 32], sizes = [2, 32], strides = [1, 1]} : vector<2x64xf32> to vector<2x32xf32>
    %178 = tpu.concatenate %176, %177 in 1 : vector<2x32xf32>, vector<2x32xf32> -> vector<2x64xf32>
    %179 = vector.extract_strided_slice %124 {offsets = [0, 0], sizes = [2, 32], strides = [1, 1]} : vector<2x64xf32> to vector<2x32xf32>
    %180 = vector.extract_strided_slice %136 {offsets = [0, 32], sizes = [2, 32], strides = [1, 1]} : vector<2x64xf32> to vector<2x32xf32>
    %181 = tpu.concatenate %179, %180 in 1 : vector<2x32xf32>, vector<2x32xf32> -> vector<2x64xf32>
    %182 = vector.extract_strided_slice %128 {offsets = [0, 0], sizes = [2, 32], strides = [1, 1]} : vector<2x64xf32> to vector<2x32xf32>
    %183 = vector.extract_strided_slice %132 {offsets = [0, 32], sizes = [2, 32], strides = [1, 1]} : vector<2x64xf32> to vector<2x32xf32>
    %184 = tpu.concatenate %182, %183 in 1 : vector<2x32xf32>, vector<2x32xf32> -> vector<2x64xf32>
    %185 = vector.extract_strided_slice %132 {offsets = [0, 0], sizes = [2, 32], strides = [1, 1]} : vector<2x64xf32> to vector<2x32xf32>
    %186 = vector.extract_strided_slice %128 {offsets = [0, 32], sizes = [2, 32], strides = [1, 1]} : vector<2x64xf32> to vector<2x32xf32>
    %187 = tpu.concatenate %185, %186 in 1 : vector<2x32xf32>, vector<2x32xf32> -> vector<2x64xf32>
    %188 = vector.extract_strided_slice %136 {offsets = [0, 0], sizes = [2, 32], strides = [1, 1]} : vector<2x64xf32> to vector<2x32xf32>
    %189 = vector.extract_strided_slice %124 {offsets = [0, 32], sizes = [2, 32], strides = [1, 1]} : vector<2x64xf32> to vector<2x32xf32>
    %190 = tpu.concatenate %188, %189 in 1 : vector<2x32xf32>, vector<2x32xf32> -> vector<2x64xf32>
    %191 = vector.extract_strided_slice %140 {offsets = [0, 0], sizes = [2, 32], strides = [1, 1]} : vector<2x64xf32> to vector<2x32xf32>
    %192 = vector.extract_strided_slice %120 {offsets = [0, 32], sizes = [2, 32], strides = [1, 1]} : vector<2x64xf32> to vector<2x32xf32>
    %193 = tpu.concatenate %191, %192 in 1 : vector<2x32xf32>, vector<2x32xf32> -> vector<2x64xf32>
    %194 = vector.extract_strided_slice %144 {offsets = [0, 0], sizes = [2, 32], strides = [1, 1]} : vector<2x64xf32> to vector<2x32xf32>
    %195 = vector.extract_strided_slice %116 {offsets = [0, 32], sizes = [2, 32], strides = [1, 1]} : vector<2x64xf32> to vector<2x32xf32>
    %196 = tpu.concatenate %194, %195 in 1 : vector<2x32xf32>, vector<2x32xf32> -> vector<2x64xf32>
    %197 = vector.extract_strided_slice %148 {offsets = [0, 0], sizes = [2, 32], strides = [1, 1]} : vector<2x64xf32> to vector<2x32xf32>
    %198 = vector.extract_strided_slice %112 {offsets = [0, 32], sizes = [2, 32], strides = [1, 1]} : vector<2x64xf32> to vector<2x32xf32>
    %199 = tpu.concatenate %197, %198 in 1 : vector<2x32xf32>, vector<2x32xf32> -> vector<2x64xf32>
    %200 = vector.extract_strided_slice %152 {offsets = [0, 0], sizes = [2, 32], strides = [1, 1]} : vector<2x64xf32> to vector<2x32xf32>
    %201 = vector.extract_strided_slice %108 {offsets = [0, 32], sizes = [2, 32], strides = [1, 1]} : vector<2x64xf32> to vector<2x32xf32>
    %202 = tpu.concatenate %200, %201 in 1 : vector<2x32xf32>, vector<2x32xf32> -> vector<2x64xf32>
    %203 = vector.extract_strided_slice %156 {offsets = [0, 0], sizes = [2, 32], strides = [1, 1]} : vector<2x64xf32> to vector<2x32xf32>
    %204 = vector.extract_strided_slice %104 {offsets = [0, 32], sizes = [2, 32], strides = [1, 1]} : vector<2x64xf32> to vector<2x32xf32>
    %205 = tpu.concatenate %203, %204 in 1 : vector<2x32xf32>, vector<2x32xf32> -> vector<2x64xf32>
    %206 = vector.extract_strided_slice %160 {offsets = [0, 0], sizes = [2, 32], strides = [1, 1]} : vector<2x64xf32> to vector<2x32xf32>
    %207 = vector.extract_strided_slice %100 {offsets = [0, 32], sizes = [2, 32], strides = [1, 1]} : vector<2x64xf32> to vector<2x32xf32>
    %208 = tpu.concatenate %206, %207 in 1 : vector<2x32xf32>, vector<2x32xf32> -> vector<2x64xf32>
    %209 = vector.shape_cast %163 : vector<2x64xf32> to vector<2x1x64xf32>
    %210 = vector.shape_cast %166 : vector<2x64xf32> to vector<2x1x64xf32>
    %211 = vector.shape_cast %169 : vector<2x64xf32> to vector<2x1x64xf32>
    %212 = vector.shape_cast %172 : vector<2x64xf32> to vector<2x1x64xf32>
    %213 = vector.shape_cast %175 : vector<2x64xf32> to vector<2x1x64xf32>
    %214 = vector.shape_cast %178 : vector<2x64xf32> to vector<2x1x64xf32>
    %215 = vector.shape_cast %181 : vector<2x64xf32> to vector<2x1x64xf32>
    %216 = vector.shape_cast %184 : vector<2x64xf32> to vector<2x1x64xf32>
    %217 = vector.shape_cast %187 : vector<2x64xf32> to vector<2x1x64xf32>
    %218 = vector.shape_cast %190 : vector<2x64xf32> to vector<2x1x64xf32>
    %219 = vector.shape_cast %193 : vector<2x64xf32> to vector<2x1x64xf32>
    %220 = vector.shape_cast %196 : vector<2x64xf32> to vector<2x1x64xf32>
    %221 = vector.shape_cast %199 : vector<2x64xf32> to vector<2x1x64xf32>
    %222 = vector.shape_cast %202 : vector<2x64xf32> to vector<2x1x64xf32>
    %223 = vector.shape_cast %205 : vector<2x64xf32> to vector<2x1x64xf32>
    %224 = vector.shape_cast %208 : vector<2x64xf32> to vector<2x1x64xf32>
    %225 = tpu.concatenate %209, %210, %211, %212, %213, %214, %215, %216, %217, %218, %219, %220, %221, %222, %223, %224 in 1 : vector<2x1x64xf32>, vector<2x1x64xf32>, vector<2x1x64xf32>, vector<2x1x64xf32>, vector<2x1x64xf32>, vector<2x1x64xf32>, vector<2x1x64xf32>, vector<2x1x64xf32>, vector<2x1x64xf32>, vector<2x1x64xf32>, vector<2x1x64xf32>, vector<2x1x64xf32>, vector<2x1x64xf32>, vector<2x1x64xf32>, vector<2x1x64xf32>, vector<2x1x64xf32> -> vector<2x16x64xf32>
    %226 = vector.shape_cast %225 : vector<2x16x64xf32> to vector<32x64xf32>
    %227 = arith.truncf %226 : vector<32x64xf32> to vector<32x64xbf16>
    %c0_31 = arith.constant 0 : index
    %c0_32 = arith.constant 0 : index
    %228 = vector.load %arg6[%c0_31, %c0_32] : memref<64x48xbf16, #tpu.memory_space<vmem>>, vector<64x48xbf16>
    %cst_33 = arith.constant dense<0.000000e+00> : vector<32x48xf32>
    %229 = tpu.matmul %227, %228, %cst_33 {dimension_numbers = #tpu.dot_dimension_numbers<[1], [0], [0], [1], [0, 0, 1, 1], [], []>} : vector<32x64xbf16>, vector<64x48xbf16>, vector<32x48xf32> -> vector<32x48xf32>
    %c0_34 = arith.constant 0 : index
    %c0_35 = arith.constant 0 : index
    %230 = vector.load %arg7[%c0_34, %c0_35] : memref<1x48xf32, #tpu.memory_space<vmem>>, vector<1x48xf32>
    %231 = vector.broadcast %230 : vector<1x48xf32> to vector<32x48xf32>
    %232 = arith.addf %229, %231 : vector<32x48xf32>
    %233 = vector.shape_cast %232 : vector<32x48xf32> to vector<2x16x48xf32>
    %234 = vector.extract_strided_slice %233 {offsets = [0, 0, 0], sizes = [2, 16, 24], strides = [1, 1, 1]} : vector<2x16x48xf32> to vector<2x16x24xf32>
    %235 = vector.extract_strided_slice %233 {offsets = [0, 0, 24], sizes = [2, 16, 24], strides = [1, 1, 1]} : vector<2x16x48xf32> to vector<2x16x24xf32>
    %cst_36 = arith.constant 1.000000e+00 : f32
    %236 = vector.broadcast %cst_36 : f32 to vector<2x16x24xf32>
    %237 = arith.subf %236, %5 : vector<2x16x24xf32>
    %238 = arith.mulf %237, %234 : vector<2x16x24xf32>
    %239 = arith.addf %7, %238 : vector<2x16x24xf32>
    %240 = arith.mulf %237, %235 : vector<2x16x24xf32>
    %241 = arith.addf %7, %240 : vector<2x16x24xf32>
    %242 = vector.extract_strided_slice %239 {offsets = [0, 0, 0], sizes = [2, 1, 24], strides = [1, 1, 1]} : vector<2x16x24xf32> to vector<2x1x24xf32>
    %cst_37 = arith.constant 6.250000e-02 : f32
    %243 = vector.broadcast %cst_37 : f32 to vector<2x1x24xf32>
    %244 = arith.mulf %243, %242 : vector<2x1x24xf32>
    %245 = vector.extract_strided_slice %241 {offsets = [0, 15, 0], sizes = [2, 1, 24], strides = [1, 1, 1]} : vector<2x16x24xf32> to vector<2x1x24xf32>
    %cst_38 = arith.constant 1.000000e+00 : f32
    %246 = vector.broadcast %cst_38 : f32 to vector<2x1x24xf32>
    %247 = arith.mulf %246, %245 : vector<2x1x24xf32>
    %248 = arith.addf %244, %247 : vector<2x1x24xf32>
    %249 = vector.extract_strided_slice %239 {offsets = [0, 1, 0], sizes = [2, 1, 24], strides = [1, 1, 1]} : vector<2x16x24xf32> to vector<2x1x24xf32>
    %cst_39 = arith.constant 1.250000e-01 : f32
    %250 = vector.broadcast %cst_39 : f32 to vector<2x1x24xf32>
    %251 = arith.mulf %250, %249 : vector<2x1x24xf32>
    %252 = vector.extract_strided_slice %241 {offsets = [0, 14, 0], sizes = [2, 1, 24], strides = [1, 1, 1]} : vector<2x16x24xf32> to vector<2x1x24xf32>
    %cst_40 = arith.constant 9.375000e-01 : f32
    %253 = vector.broadcast %cst_40 : f32 to vector<2x1x24xf32>
    %254 = arith.mulf %253, %252 : vector<2x1x24xf32>
    %255 = arith.addf %251, %254 : vector<2x1x24xf32>
    %256 = vector.extract_strided_slice %239 {offsets = [0, 2, 0], sizes = [2, 1, 24], strides = [1, 1, 1]} : vector<2x16x24xf32> to vector<2x1x24xf32>
    %cst_41 = arith.constant 1.875000e-01 : f32
    %257 = vector.broadcast %cst_41 : f32 to vector<2x1x24xf32>
    %258 = arith.mulf %257, %256 : vector<2x1x24xf32>
    %259 = vector.extract_strided_slice %241 {offsets = [0, 13, 0], sizes = [2, 1, 24], strides = [1, 1, 1]} : vector<2x16x24xf32> to vector<2x1x24xf32>
    %cst_42 = arith.constant 8.750000e-01 : f32
    %260 = vector.broadcast %cst_42 : f32 to vector<2x1x24xf32>
    %261 = arith.mulf %260, %259 : vector<2x1x24xf32>
    %262 = arith.addf %258, %261 : vector<2x1x24xf32>
    %263 = vector.extract_strided_slice %239 {offsets = [0, 3, 0], sizes = [2, 1, 24], strides = [1, 1, 1]} : vector<2x16x24xf32> to vector<2x1x24xf32>
    %cst_43 = arith.constant 2.500000e-01 : f32
    %264 = vector.broadcast %cst_43 : f32 to vector<2x1x24xf32>
    %265 = arith.mulf %264, %263 : vector<2x1x24xf32>
    %266 = vector.extract_strided_slice %241 {offsets = [0, 12, 0], sizes = [2, 1, 24], strides = [1, 1, 1]} : vector<2x16x24xf32> to vector<2x1x24xf32>
    %cst_44 = arith.constant 8.125000e-01 : f32
    %267 = vector.broadcast %cst_44 : f32 to vector<2x1x24xf32>
    %268 = arith.mulf %267, %266 : vector<2x1x24xf32>
    %269 = arith.addf %265, %268 : vector<2x1x24xf32>
    %270 = vector.extract_strided_slice %239 {offsets = [0, 4, 0], sizes = [2, 1, 24], strides = [1, 1, 1]} : vector<2x16x24xf32> to vector<2x1x24xf32>
    %cst_45 = arith.constant 3.125000e-01 : f32
    %271 = vector.broadcast %cst_45 : f32 to vector<2x1x24xf32>
    %272 = arith.mulf %271, %270 : vector<2x1x24xf32>
    %273 = vector.extract_strided_slice %241 {offsets = [0, 11, 0], sizes = [2, 1, 24], strides = [1, 1, 1]} : vector<2x16x24xf32> to vector<2x1x24xf32>
    %cst_46 = arith.constant 7.500000e-01 : f32
    %274 = vector.broadcast %cst_46 : f32 to vector<2x1x24xf32>
    %275 = arith.mulf %274, %273 : vector<2x1x24xf32>
    %276 = arith.addf %272, %275 : vector<2x1x24xf32>
    %277 = vector.extract_strided_slice %239 {offsets = [0, 5, 0], sizes = [2, 1, 24], strides = [1, 1, 1]} : vector<2x16x24xf32> to vector<2x1x24xf32>
    %cst_47 = arith.constant 3.750000e-01 : f32
    %278 = vector.broadcast %cst_47 : f32 to vector<2x1x24xf32>
    %279 = arith.mulf %278, %277 : vector<2x1x24xf32>
    %280 = vector.extract_strided_slice %241 {offsets = [0, 10, 0], sizes = [2, 1, 24], strides = [1, 1, 1]} : vector<2x16x24xf32> to vector<2x1x24xf32>
    %cst_48 = arith.constant 6.875000e-01 : f32
    %281 = vector.broadcast %cst_48 : f32 to vector<2x1x24xf32>
    %282 = arith.mulf %281, %280 : vector<2x1x24xf32>
    %283 = arith.addf %279, %282 : vector<2x1x24xf32>
    %284 = vector.extract_strided_slice %239 {offsets = [0, 6, 0], sizes = [2, 1, 24], strides = [1, 1, 1]} : vector<2x16x24xf32> to vector<2x1x24xf32>
    %cst_49 = arith.constant 4.375000e-01 : f32
    %285 = vector.broadcast %cst_49 : f32 to vector<2x1x24xf32>
    %286 = arith.mulf %285, %284 : vector<2x1x24xf32>
    %287 = vector.extract_strided_slice %241 {offsets = [0, 9, 0], sizes = [2, 1, 24], strides = [1, 1, 1]} : vector<2x16x24xf32> to vector<2x1x24xf32>
    %cst_50 = arith.constant 6.250000e-01 : f32
    %288 = vector.broadcast %cst_50 : f32 to vector<2x1x24xf32>
    %289 = arith.mulf %288, %287 : vector<2x1x24xf32>
    %290 = arith.addf %286, %289 : vector<2x1x24xf32>
    %291 = vector.extract_strided_slice %239 {offsets = [0, 7, 0], sizes = [2, 1, 24], strides = [1, 1, 1]} : vector<2x16x24xf32> to vector<2x1x24xf32>
    %cst_51 = arith.constant 5.000000e-01 : f32
    %292 = vector.broadcast %cst_51 : f32 to vector<2x1x24xf32>
    %293 = arith.mulf %292, %291 : vector<2x1x24xf32>
    %294 = vector.extract_strided_slice %241 {offsets = [0, 8, 0], sizes = [2, 1, 24], strides = [1, 1, 1]} : vector<2x16x24xf32> to vector<2x1x24xf32>
    %cst_52 = arith.constant 5.625000e-01 : f32
    %295 = vector.broadcast %cst_52 : f32 to vector<2x1x24xf32>
    %296 = arith.mulf %295, %294 : vector<2x1x24xf32>
    %297 = arith.addf %293, %296 : vector<2x1x24xf32>
    %298 = vector.extract_strided_slice %239 {offsets = [0, 8, 0], sizes = [2, 1, 24], strides = [1, 1, 1]} : vector<2x16x24xf32> to vector<2x1x24xf32>
    %cst_53 = arith.constant 5.625000e-01 : f32
    %299 = vector.broadcast %cst_53 : f32 to vector<2x1x24xf32>
    %300 = arith.mulf %299, %298 : vector<2x1x24xf32>
    %301 = vector.extract_strided_slice %241 {offsets = [0, 7, 0], sizes = [2, 1, 24], strides = [1, 1, 1]} : vector<2x16x24xf32> to vector<2x1x24xf32>
    %cst_54 = arith.constant 5.000000e-01 : f32
    %302 = vector.broadcast %cst_54 : f32 to vector<2x1x24xf32>
    %303 = arith.mulf %302, %301 : vector<2x1x24xf32>
    %304 = arith.addf %300, %303 : vector<2x1x24xf32>
    %305 = vector.extract_strided_slice %239 {offsets = [0, 9, 0], sizes = [2, 1, 24], strides = [1, 1, 1]} : vector<2x16x24xf32> to vector<2x1x24xf32>
    %cst_55 = arith.constant 6.250000e-01 : f32
    %306 = vector.broadcast %cst_55 : f32 to vector<2x1x24xf32>
    %307 = arith.mulf %306, %305 : vector<2x1x24xf32>
    %308 = vector.extract_strided_slice %241 {offsets = [0, 6, 0], sizes = [2, 1, 24], strides = [1, 1, 1]} : vector<2x16x24xf32> to vector<2x1x24xf32>
    %cst_56 = arith.constant 4.375000e-01 : f32
    %309 = vector.broadcast %cst_56 : f32 to vector<2x1x24xf32>
    %310 = arith.mulf %309, %308 : vector<2x1x24xf32>
    %311 = arith.addf %307, %310 : vector<2x1x24xf32>
    %312 = vector.extract_strided_slice %239 {offsets = [0, 10, 0], sizes = [2, 1, 24], strides = [1, 1, 1]} : vector<2x16x24xf32> to vector<2x1x24xf32>
    %cst_57 = arith.constant 6.875000e-01 : f32
    %313 = vector.broadcast %cst_57 : f32 to vector<2x1x24xf32>
    %314 = arith.mulf %313, %312 : vector<2x1x24xf32>
    %315 = vector.extract_strided_slice %241 {offsets = [0, 5, 0], sizes = [2, 1, 24], strides = [1, 1, 1]} : vector<2x16x24xf32> to vector<2x1x24xf32>
    %cst_58 = arith.constant 3.750000e-01 : f32
    %316 = vector.broadcast %cst_58 : f32 to vector<2x1x24xf32>
    %317 = arith.mulf %316, %315 : vector<2x1x24xf32>
    %318 = arith.addf %314, %317 : vector<2x1x24xf32>
    %319 = vector.extract_strided_slice %239 {offsets = [0, 11, 0], sizes = [2, 1, 24], strides = [1, 1, 1]} : vector<2x16x24xf32> to vector<2x1x24xf32>
    %cst_59 = arith.constant 7.500000e-01 : f32
    %320 = vector.broadcast %cst_59 : f32 to vector<2x1x24xf32>
    %321 = arith.mulf %320, %319 : vector<2x1x24xf32>
    %322 = vector.extract_strided_slice %241 {offsets = [0, 4, 0], sizes = [2, 1, 24], strides = [1, 1, 1]} : vector<2x16x24xf32> to vector<2x1x24xf32>
    %cst_60 = arith.constant 3.125000e-01 : f32
    %323 = vector.broadcast %cst_60 : f32 to vector<2x1x24xf32>
    %324 = arith.mulf %323, %322 : vector<2x1x24xf32>
    %325 = arith.addf %321, %324 : vector<2x1x24xf32>
    %326 = vector.extract_strided_slice %239 {offsets = [0, 12, 0], sizes = [2, 1, 24], strides = [1, 1, 1]} : vector<2x16x24xf32> to vector<2x1x24xf32>
    %cst_61 = arith.constant 8.125000e-01 : f32
    %327 = vector.broadcast %cst_61 : f32 to vector<2x1x24xf32>
    %328 = arith.mulf %327, %326 : vector<2x1x24xf32>
    %329 = vector.extract_strided_slice %241 {offsets = [0, 3, 0], sizes = [2, 1, 24], strides = [1, 1, 1]} : vector<2x16x24xf32> to vector<2x1x24xf32>
    %cst_62 = arith.constant 2.500000e-01 : f32
    %330 = vector.broadcast %cst_62 : f32 to vector<2x1x24xf32>
    %331 = arith.mulf %330, %329 : vector<2x1x24xf32>
    %332 = arith.addf %328, %331 : vector<2x1x24xf32>
    %333 = vector.extract_strided_slice %239 {offsets = [0, 13, 0], sizes = [2, 1, 24], strides = [1, 1, 1]} : vector<2x16x24xf32> to vector<2x1x24xf32>
    %cst_63 = arith.constant 8.750000e-01 : f32
    %334 = vector.broadcast %cst_63 : f32 to vector<2x1x24xf32>
    %335 = arith.mulf %334, %333 : vector<2x1x24xf32>
    %336 = vector.extract_strided_slice %241 {offsets = [0, 2, 0], sizes = [2, 1, 24], strides = [1, 1, 1]} : vector<2x16x24xf32> to vector<2x1x24xf32>
    %cst_64 = arith.constant 1.875000e-01 : f32
    %337 = vector.broadcast %cst_64 : f32 to vector<2x1x24xf32>
    %338 = arith.mulf %337, %336 : vector<2x1x24xf32>
    %339 = arith.addf %335, %338 : vector<2x1x24xf32>
    %340 = vector.extract_strided_slice %239 {offsets = [0, 14, 0], sizes = [2, 1, 24], strides = [1, 1, 1]} : vector<2x16x24xf32> to vector<2x1x24xf32>
    %cst_65 = arith.constant 9.375000e-01 : f32
    %341 = vector.broadcast %cst_65 : f32 to vector<2x1x24xf32>
    %342 = arith.mulf %341, %340 : vector<2x1x24xf32>
    %343 = vector.extract_strided_slice %241 {offsets = [0, 1, 0], sizes = [2, 1, 24], strides = [1, 1, 1]} : vector<2x16x24xf32> to vector<2x1x24xf32>
    %cst_66 = arith.constant 1.250000e-01 : f32
    %344 = vector.broadcast %cst_66 : f32 to vector<2x1x24xf32>
    %345 = arith.mulf %344, %343 : vector<2x1x24xf32>
    %346 = arith.addf %342, %345 : vector<2x1x24xf32>
    %347 = vector.extract_strided_slice %239 {offsets = [0, 15, 0], sizes = [2, 1, 24], strides = [1, 1, 1]} : vector<2x16x24xf32> to vector<2x1x24xf32>
    %cst_67 = arith.constant 1.000000e+00 : f32
    %348 = vector.broadcast %cst_67 : f32 to vector<2x1x24xf32>
    %349 = arith.mulf %348, %347 : vector<2x1x24xf32>
    %350 = vector.extract_strided_slice %241 {offsets = [0, 0, 0], sizes = [2, 1, 24], strides = [1, 1, 1]} : vector<2x16x24xf32> to vector<2x1x24xf32>
    %cst_68 = arith.constant 6.250000e-02 : f32
    %351 = vector.broadcast %cst_68 : f32 to vector<2x1x24xf32>
    %352 = arith.mulf %351, %350 : vector<2x1x24xf32>
    %353 = arith.addf %349, %352 : vector<2x1x24xf32>
    %354 = tpu.concatenate %248, %255, %262, %269, %276, %283, %290, %297, %304, %311, %318, %325, %332, %339, %346, %353 in 1 : vector<2x1x24xf32>, vector<2x1x24xf32>, vector<2x1x24xf32>, vector<2x1x24xf32>, vector<2x1x24xf32>, vector<2x1x24xf32>, vector<2x1x24xf32>, vector<2x1x24xf32>, vector<2x1x24xf32>, vector<2x1x24xf32>, vector<2x1x24xf32>, vector<2x1x24xf32>, vector<2x1x24xf32>, vector<2x1x24xf32>, vector<2x1x24xf32>, vector<2x1x24xf32> -> vector<2x16x24xf32>
    %c0_69 = arith.constant 0 : index
    %c0_70 = arith.constant 0 : index
    %c0_71 = arith.constant 0 : index
    %355 = vector.load %arg8[%c0_69, %c0_70, %c0_71] : memref<2x16x24xf32, #tpu.memory_space<vmem>>, vector<2x16x24xf32>
    tpu.vector_store %arg8[%c0_69, %c0_70, %c0_71], %354 {strides = array<i32>} : memref<2x16x24xf32, #tpu.memory_space<vmem>>, vector<2x16x24xf32>,
    return
  }
}

</mosaic_0001>

<bundles_post_ra>
// kernel: sub.4
= control target key start
LH: loop header
LB: loop body
LE: loop exit
PB: predicated region body
PF: predicated region fallthrough
CT: control target
= control target key end

     0   :  { %s100_s0 = inlined_call_operand.vmem [shape: f32[2,16,24], index: 0, kind: input, shape index: {}]   ;;  %s101_s1 = inlined_call_operand.vmem [shape: f32[2,16,24], index: 1, kind: input, shape index: {}]   ;;  %s102_s2 = inlined_call_operand.vmem [shape: f32[2,16,24], index: 2, kind: output, shape index: {}]  }
   0x1   :  { %v3_v0 = vld [vmem:[%s100_s0] sm:$0xff]  ;;  %v40_v2 = vld [vmem:[%s100_s0 + $0x10] sm:$0xff]  ;;  %v43_v5 = vld [vmem:[%s100_s0 + $0x8] sm:$0xff] }
   0x2   :  { %v4_v1 = vld [vmem:[%s101_s1] sm:$0xff]  ;;  %v41_v4 = vld [vmem:[%s101_s1 + $0x10] sm:$0xff]  ;;  %v44_v6 = vld [vmem:[%s101_s1 + $0x8] sm:$0xff] }
   0x3   :  { %v7_v3 = vsub.f32 %v3_v0, %v4_v1  ;;  %v16_v7 = vsub.f32 %v40_v2, %v41_v4  ;;  %v26_v8 = vsub.f32 %v43_v5, %v44_v6  ;;  %v46_v9 = vld [vmem:[%s100_s0 + $0x18] sm:$0xff] }
   0x4   :  { %v47_v10 = vld [vmem:[%s101_s1 + $0x18] sm:$0xff] }
   0x5   :  { %9 = vst [vmem:[%s102_s2] sm:$0xff] %v7_v3  ;;  %v36_v11 = vsub.f32 %v46_v9, %v47_v10 }
   0x6   :  { %42 = vst [vmem:[%s102_s2 + $0x10] sm:$0xff] %v16_v7 }
   0x7   :  { %45 = vst [vmem:[%s102_s2 + $0x8] sm:$0xff] %v26_v8 }
   0x8   :  { %48 = vst [vmem:[%s102_s2 + $0x18] sm:$0xff] %v36_v11 }

// kernel: mul.3
= control target key start
LH: loop header
LB: loop body
LE: loop exit
PB: predicated region body
PF: predicated region fallthrough
CT: control target
= control target key end

     0   :  { %s540_s0 = inlined_call_operand.vmem [shape: f32[2,16,24], index: 0, kind: input, shape index: {}]   ;;  %s541_s1 = inlined_call_operand.vmem [shape: f32[2,16,24], index: 1, kind: input, shape index: {}]   ;;  %s542_s2 = inlined_call_operand.vmem [shape: f32[2,16,24], index: 2, kind: output, shape index: {}]  }
   0x1   :  { %v3_v0 = vld [vmem:[%s540_s0] sm:$0x3]  ;;  %v240_v2 = vld [vmem:[%s540_s0 + $0x2] sm:$0x3]  ;;  %v243_v5 = vld [vmem:[%s540_s0 + $0x4] sm:$0x3] }
   0x2   :  { %v4_v1 = vld [vmem:[%s541_s1] sm:$0x3]  ;;  %v241_v4 = vld [vmem:[%s541_s1 + $0x2] sm:$0x3]  ;;  %v244_v6 = vld [vmem:[%s541_s1 + $0x4] sm:$0x3] }
   0x3   :  { %v7_v3 = vmul.f32 %v4_v1, %v3_v0  ;;  %v16_v7 = vmul.f32 %v241_v4, %v240_v2  ;;  %v26_v8 = vmul.f32 %v244_v6, %v243_v5  ;;  %v246_v9 = vld [vmem:[%s540_s0 + $0x6] sm:$0x3]  ;;  %v249_v11 = vld [vmem:[%s540_s0 + $0x8] sm:$0x3]  ;;  %v252_v14 = vld [vmem:[%s540_s0 + $0xa] sm:$0x3] }
   0x4   :  { %v247_v10 = vld [vmem:[%s541_s1 + $0x6] sm:$0x3]  ;;  %v250_v13 = vld [vmem:[%s541_s1 + $0x8] sm:$0x3]  ;;  %v253_v16 = vld [vmem:[%s541_s1 + $0xa] sm:$0x3] }
   0x5   :  { %9 = vst [vmem:[%s542_s2] sm:$0x3] %v7_v3  ;;  %v36_v12 = vmul.f32 %v247_v10, %v246_v9  ;;  %v46_v15 = vmul.f32 %v250_v13, %v249_v11  ;;  %v255_v17 = vld [vmem:[%s540_s0 + $0xc] sm:$0x3]  ;;  %v56_v18 = vmul.f32 %v253_v16, %v252_v14  ;;  %v258_v20 = vld [vmem:[%s540_s0 + $0xe] sm:$0x3] }
   0x6   :  { %242 = vst [vmem:[%s542_s2 + $0x2] sm:$0x3] %v16_v7  ;;  %v256_v19 = vld [vmem:[%s541_s1 + $0xc] sm:$0x3]  ;;  %v259_v22 = vld [vmem:[%s541_s1 + $0xe] sm:$0x3] }
   0x7   :  { %245 = vst [vmem:[%s542_s2 + $0x4] sm:$0x3] %v26_v8  ;;  %v66_v21 = vmul.f32 %v256_v19, %v255_v17  ;;  %v261_v23 = vld [vmem:[%s540_s0 + $0x10] sm:$0x3]  ;;  %v76_v24 = vmul.f32 %v259_v22, %v258_v20  ;;  %v264_v26 = vld [vmem:[%s540_s0 + $0x12] sm:$0x3] }
   0x8   :  { %248 = vst [vmem:[%s542_s2 + $0x6] sm:$0x3] %v36_v12  ;;  %v262_v25 = vld [vmem:[%s541_s1 + $0x10] sm:$0x3]  ;;  %v265_v28 = vld [vmem:[%s541_s1 + $0x12] sm:$0x3] }
   0x9   :  { %251 = vst [vmem:[%s542_s2 + $0x8] sm:$0x3] %v46_v15  ;;  %v86_v27 = vmul.f32 %v262_v25, %v261_v23  ;;  %v267_v29 = vld [vmem:[%s540_s0 + $0x14] sm:$0x3]  ;;  %v96_v30 = vmul.f32 %v265_v28, %v264_v26  ;;  %v270_v32 = vld [vmem:[%s540_s0 + $0x16] sm:$0x3] }
   0xa   :  { %254 = vst [vmem:[%s542_s2 + $0xa] sm:$0x3] %v56_v18  ;;  %v268_v31 = vld [vmem:[%s541_s1 + $0x14] sm:$0x3]  ;;  %v271_v34 = vld [vmem:[%s541_s1 + $0x16] sm:$0x3] }
   0xb   :  { %257 = vst [vmem:[%s542_s2 + $0xc] sm:$0x3] %v66_v21  ;;  %v106_v33 = vmul.f32 %v268_v31, %v267_v29  ;;  %v273_v35 = vld [vmem:[%s540_s0 + $0x18] sm:$0x3]  ;;  %v116_v36 = vmul.f32 %v271_v34, %v270_v32  ;;  %v276_v38 = vld [vmem:[%s540_s0 + $0x1a] sm:$0x3] }
   0xc   :  { %260 = vst [vmem:[%s542_s2 + $0xe] sm:$0x3] %v76_v24  ;;  %v274_v37 = vld [vmem:[%s541_s1 + $0x18] sm:$0x3]  ;;  %v277_v40 = vld [vmem:[%s541_s1 + $0x1a] sm:$0x3] }
   0xd   :  { %263 = vst [vmem:[%s542_s2 + $0x10] sm:$0x3] %v86_v27  ;;  %v126_v39 = vmul.f32 %v274_v37, %v273_v35  ;;  %v279_v41 = vld [vmem:[%s540_s0 + $0x1c] sm:$0x3]  ;;  %v136_v42 = vmul.f32 %v277_v40, %v276_v38  ;;  %v282_v44 = vld [vmem:[%s540_s0 + $0x1e] sm:$0x3] }
   0xe   :  { %266 = vst [vmem:[%s542_s2 + $0x12] sm:$0x3] %v96_v30  ;;  %v280_v43 = vld [vmem:[%s541_s1 + $0x1c] sm:$0x3]  ;;  %v283_v46 = vld [vmem:[%s541_s1 + $0x1e] sm:$0x3] }
   0xf   :  { %269 = vst [vmem:[%s542_s2 + $0x14] sm:$0x3] %v106_v33  ;;  %v146_v45 = vmul.f32 %v280_v43, %v279_v41  ;;  %v285_v47 = vld [vmem:[%s540_s0 + $0x20] sm:$0x3]  ;;  %v156_v48 = vmul.f32 %v283_v46, %v282_v44  ;;  %v288_v50 = vld [vmem:[%s540_s0 + $0x22] sm:$0x3] }
  0x10   :  { %272 = vst [vmem:[%s542_s2 + $0x16] sm:$0x3] %v116_v36  ;;  %v286_v49 = vld [vmem:[%s541_s1 + $0x20] sm:$0x3]  ;;  %v289_v52 = vld [vmem:[%s541_s1 + $0x22] sm:$0x3] }
  0x11   :  { %275 = vst [vmem:[%s542_s2 + $0x18] sm:$0x3] %v126_v39  ;;  %v166_v51 = vmul.f32 %v286_v49, %v285_v47  ;;  %v291_v53 = vld [vmem:[%s540_s0 + $0x24] sm:$0x3]  ;;  %v176_v54 = vmul.f32 %v289_v52, %v288_v50  ;;  %v294_v56 = vld [vmem:[%s540_s0 + $0x26] sm:$0x3] }
  0x12   :  { %278 = vst [vmem:[%s542_s2 + $0x1a] sm:$0x3] %v136_v42  ;;  %v292_v55 = vld [vmem:[%s541_s1 + $0x24] sm:$0x3]  ;;  %v295_v58 = vld [vmem:[%s541_s1 + $0x26] sm:$0x3] }
  0x13   :  { %281 = vst [vmem:[%s542_s2 + $0x1c] sm:$0x3] %v146_v45  ;;  %v186_v57 = vmul.f32 %v292_v55, %v291_v53  ;;  %v297_v59 = vld [vmem:[%s540_s0 + $0x28] sm:$0x3]  ;;  %v196_v60 = vmul.f32 %v295_v58, %v294_v56  ;;  %v300_v62 = vld [vmem:[%s540_s0 + $0x2a] sm:$0x3] }
  0x14   :  { %284 = vst [vmem:[%s542_s2 + $0x1e] sm:$0x3] %v156_v48  ;;  %v298_v61 = vld [vmem:[%s541_s1 + $0x28] sm:$0x3]  ;;  %v301_v0 = vld [vmem:[%s541_s1 + $0x2a] sm:$0x3] }
  0x15   :  { %287 = vst [vmem:[%s542_s2 + $0x20] sm:$0x3] %v166_v51  ;;  %v206_v63 = vmul.f32 %v298_v61, %v297_v59  ;;  %v303_v1 = vld [vmem:[%s540_s0 + $0x2c] sm:$0x3]  ;;  %v216_v2 = vmul.f32 %v301_v0, %v300_v62  ;;  %v306_v4 = vld [vmem:[%s540_s0 + $0x2e] sm:$0x3] }
  0x16   :  { %290 = vst [vmem:[%s542_s2 + $0x22] sm:$0x3] %v176_v54  ;;  %v304_v3 = vld [vmem:[%s541_s1 + $0x2c] sm:$0x3]  ;;  %v307_v6 = vld [vmem:[%s541_s1 + $0x2e] sm:$0x3] }
  0x17   :  { %293 = vst [vmem:[%s542_s2 + $0x24] sm:$0x3] %v186_v57  ;;  %v226_v5 = vmul.f32 %v304_v3, %v303_v1  ;;  %v236_v7 = vmul.f32 %v307_v6, %v306_v4 }
  0x18   :  { %296 = vst [vmem:[%s542_s2 + $0x26] sm:$0x3] %v196_v60 }
  0x19   :  { %299 = vst [vmem:[%s542_s2 + $0x28] sm:$0x3] %v206_v63 }
  0x1a   :  { %302 = vst [vmem:[%s542_s2 + $0x2a] sm:$0x3] %v216_v2 }
  0x1b   :  { %305 = vst [vmem:[%s542_s2 + $0x2c] sm:$0x3] %v226_v5 }
  0x1c   :  { %308 = vst [vmem:[%s542_s2 + $0x2e] sm:$0x3] %v236_v7 }

// kernel: graph_imputer_forward.1
= control target key start
LH: loop header
LB: loop body
LE: loop exit
PB: predicated region body
PF: predicated region fallthrough
CT: control target
= control target key end

     0   :  { %vm44_vm0 = vcmask 1041408   ;;  %vm37_vm1 = vcmask 31744   ;;  %vm100_vm2 = vcmask 1043456   ;;  %v1364_v17 = vmov 0   ;;  %s1365_s17 = smov 104   ;;  %s2003_s2 = inlined_call_operand.vmem [shape: bf16[4,24], index: 2, kind: input, shape index: {}]   ;;  %s2004_s1 = inlined_call_operand.vmem [shape: f32[2,16,4], index: 1, kind: input, shape index: {}]   ;;  %s2005_s3 = inlined_call_operand.vmem [shape: bf16[24,64], index: 3, kind: input, shape index: {}]   ;;  %s2006_s4 = inlined_call_operand.vmem [shape: f32[1,64], index: 4, kind: input, shape index: {}]   ;;  %s2007_s5 = inlined_call_operand.vmem [shape: bf16[64,64], index: 5, kind: input, shape index: {}]   ;;  %s2008_s0 = inlined_call_operand.vmem [shape: f32[2,16,24], index: 0, kind: input, shape index: {}]   ;;  %s2009_s7 = inlined_call_operand.vmem [shape: f32[1,48], index: 7, kind: input, shape index: {}]   ;;  %s2010_s6 = inlined_call_operand.vmem [shape: bf16[64,48], index: 6, kind: input, shape index: {}]   ;;  %s2011_s8 = inlined_call_operand.vmem [shape: f32[2,16,24], index: 8, kind: output, shape index: {}]  }
   0x1   :  { %v36_v0 = vld [vmem:[%s2003_s2] sm:$0x3]  ;;  %v31_v2 = vld [vmem:[%s2004_s1 + $0x8] sm:$0xff]  ;;  %v32_v5 = vld [vmem:[%s2004_s1 + $0x10] sm:$0xff]  ;;  %vm93_vm3 = vcmask 195584   ;;  %vm135_vm4 = vcmask 261120  }
   0x2   :  { %v30_v1 = vld [vmem:[%s2004_s1] sm:$0xff]  ;;  %v46_v3 = vsel %vm44_vm0, %v36_v0, 0  ;;  %v33_v6 = vld [vmem:[%s2004_s1 + $0x18] sm:$0xff]  ;;  %v79_v7 = vld [vmem:[%s2005_s3 + $0x8] sm:$0xf]  ;;  %vm126_vm5 = vcmask 1041409  }
   0x3   :  { %v34_v4 = vpack.c.bf16 %v31_v2, %v30_v1  ;;  %55 = vmatpush.bf16.msra.mxu0 %v46_v3  ;;  %1323 = vmatpush.bf16.msra.mxu1 %v46_v3  ;;  %v35_v8 = vpack.c.bf16 %v33_v6, %v32_v5  ;;  %v89_v9 = vunpack.c.l.b16 %v79_v7  ;;  %v1314_v12 = vld [vmem:[%s2005_s3] sm:$0xff]  ;;  %v1437_v13 = vld [vmem:[%s2007_s5 + $0x18] sm:$0xff]  ;;  %v1443_v14 = vld [vmem:[%s2007_s5 + $0x10] sm:$0xff]  ;;  %vm137_vm6 = vcmask 1042434  }
   0x4   :  { %273 = vmatpush.bf16.msra.mxu2 %v1437_v13  ;;  %292 = vmatpush.bf16.msra.mxu3 %v1437_v13  ;;  %v1452_v15 = vld [vmem:[%s2007_s5 + $0x8] sm:$0xff]  ;;  %v1461_v16 = vld [vmem:[%s2007_s5] sm:$0xff]  ;;  %v69_v26 = vld [vmem:[%s2008_s0 + $0x10] sm:$0xff]  ;;  %vm153_vm7 = vcmask 1044484   ;;  %vm145_vm8 = vcmask 1043459   ;;  %vm160_vm9 = vcmask 1045509  }
   0x5   :  { %v91_v10 = vpack.c.b16 %v89_v9, %v89_v9  ;;  %v67_v19 = vld [vmem:[%s2008_s0] sm:$0xff]  ;;  %v68_v20 = vld [vmem:[%s2008_s0 + $0x8] sm:$0xff]  ;;  %v70_v28 = vld [vmem:[%s2008_s0 + $0x18] sm:$0xff]  ;;  %vm166_vm10 = vcmask 1046534   ;;  %vm172_vm11 = vcmask 1047559   ;;  %vm265_vm12 = vcmask 523264  }
   0x6   :  { %1257 = vmatmul.msk.bf16.vlgmr.msra.gmra.mxu0 %vm37_vm1, %v34_v4  ;;  %1258 = vmatmul.msk.bf16.vlgmr.msra.gmra.mxu1 %vm37_vm1, %v35_v8  ;;  %v1326_v35 = vld [vmem:[%s2006_s4] ss:$0 sm:$0xff]  ;;  %vm683_vm13 = vcmask 1040384   ;;  %vm906_vm14 = vcmask 1042432   ;;  %vm911_vm15 = vcmask 1044480   ;;  %vm914_vm1 = vcmask 1045504  }
   0x7   :  { %v102_v11 = vsel %vm100_vm2, %v91_v10, 0  ;;  %375 = vmatpush.bf16.msrb.mxu0 %v1437_v13 }
   0x8   :  { %110 = vmatpush.bf16.msrb.mxu1 %v102_v11  ;;  %274 = vmatpush.bf16.msra.mxu2 %v1443_v14 }
   0x9   :  { %293 = vmatpush.bf16.msra.mxu3 %v1443_v14 }
   0xb   :  { %376 = vmatpush.bf16.msrb.mxu0 %v1443_v14 }
   0xc   :  { %111 = vmatpush.bf16.msrb.mxu1 %v1314_v12  ;;  %275 = vmatpush.bf16.msra.mxu2 %v1452_v15 }
   0xd   :  { %294 = vmatpush.bf16.msra.mxu3 %v1452_v15 }
   0xf   :  { %377 = vmatpush.bf16.msrb.mxu0 %v1452_v15 }
  0x10   :  { %399 = vmatpush.bf16.msra.mxu1 %v1437_v13  ;;  %276 = vmatpush.bf16.msra.mxu2 %v1461_v16 }
  0x11   :  { %295 = vmatpush.bf16.msra.mxu3 %v1461_v16 }
  0x13   :  { %378 = vmatpush.bf16.msrb.mxu0 %v1461_v16  ;;  %277 = vmatmul.bf16.vlgmr.msra.gmra.mxu2 %v1364_v17 }
  0x14   :  { %400 = vmatpush.bf16.msra.mxu1 %v1443_v14  ;;  %321 = vmatpush.bf16.msrb.mxu2 %v1437_v13 }
  0x15   :  { %345 = vmatpush.bf16.msrb.mxu3 %v1437_v13 }
  0x17   :  { %485 = vmatpush.bf16.msra.mxu0 %v1437_v13 }
  0x18   :  { %401 = vmatpush.bf16.msra.mxu1 %v1452_v15  ;;  %322 = vmatpush.bf16.msrb.mxu2 %v1443_v14 }
  0x19   :  { %346 = vmatpush.bf16.msrb.mxu3 %v1443_v14 }
  0x1b   :  { %486 = vmatpush.bf16.msra.mxu0 %v1443_v14 }
  0x1c   :  { %402 = vmatpush.bf16.msra.mxu1 %v1461_v16  ;;  %323 = vmatpush.bf16.msrb.mxu2 %v1452_v15 }
  0x1d   :  { %347 = vmatpush.bf16.msrb.mxu3 %v1452_v15 }
  0x1f   :  { %487 = vmatpush.bf16.msra.mxu0 %v1452_v15 }
  0x20   :  { %324 = vmatpush.bf16.msrb.mxu2 %v1461_v16 }
  0x21   :  { %348 = vmatpush.bf16.msrb.mxu3 %v1461_v16 }
  0x23   :  { %488 = vmatpush.bf16.msra.mxu0 %v1461_v16 }
  0x24   :  { %429 = vmatpush.bf16.msra.mxu2 %v1437_v13 }
  0x28   :  { %430 = vmatpush.bf16.msra.mxu2 %v1443_v14 }
  0x2c   :  { %431 = vmatpush.bf16.msra.mxu2 %v1452_v15 }
  0x30   :  { %432 = vmatpush.bf16.msra.mxu2 %v1461_v16 }
  0x83   :  { %v1475_v18 = vpop.f32.mrf.mxu0  ;;  %v1499_v24 = vpop.f32.mrf.mxu1 }
  0x84   :  { %v1493_v22 = vmul.f32 %v67_v19, %v1475_v18  ;;  %v1519_v29 = vmul.f32 %v69_v26, %v1499_v24 }
  0x8b   :  { %v1489_v21 = vpop.f32.mrf.mxu0  ;;  %v1511_v27 = vpop.f32.mrf.mxu1 }
  0x8c   :  { %v1496_v23 = vmul.f32 %v68_v20, %v1489_v21  ;;  %v1522_v30 = vmul.f32 %v70_v28, %v1511_v27 }
  0x8e   :  { %v75_v25 = vpack.c.bf16 %v1496_v23, %v1493_v22  ;;  %v76_v31 = vpack.c.bf16 %v1522_v30, %v1519_v29 }
  0x90   :  { %1263 = vmatmul.msk.bf16.vlgmr.msrb.gmra.mxu1 %vm93_vm3, %v75_v25 }
  0x91   :  { %504 = vmatpush.bf16.msrb.mxu1 %v1437_v13 }
  0x95   :  { %505 = vmatpush.bf16.msrb.mxu1 %v1443_v14 }
  0x96   :  { %v278_v32 = vpop.f32.mrf.mxu2 }
  0x99   :  { %506 = vmatpush.bf16.msrb.mxu1 %v1452_v15 }
  0x9d   :  { %507 = vmatpush.bf16.msrb.mxu1 %v1461_v16 }
  0x9e   :  { %v280_v33 = vpop.f32.mrf.mxu2 }
  0xa0   :  { %1264 = vmatmul.msk.bf16.gmra.mxu1 %vm93_vm3, %v76_v31 }
 0x10d   :  { %v113_v34 = vpop.f32.mrf.mxu1 }
 0x10e   :  { %v114_v36 = vadd.f32 %v1326_v35, %v113_v34 }
 0x110   :  { %v208_v39 = vrot.slane %v114_v36, 1  ;;  %v187_v49 = vrot.slane %v114_v36, 7  ;;  %v194_v50 = vrot.slane %v114_v36, 5  ;;  %v201_v55 = vrot.slane %v114_v36, 3 }
 0x115   :  { %v115_v37 = vpop.f32.mrf.mxu1 }
 0x116   :  { %v1531_v38 = vadd.f32 %v1326_v35, %v115_v37 }
 0x118   :  { %v156_v40 = vrot.slane %v1531_v38, 1  ;;  %v1536_v41 = vsel %vm135_vm4, %v1531_v38, %v208_v39  ;;  %v131_v3 = vrot.slane %v1531_v38, 7  ;;  %v140_v4 = vrot.slane %v1531_v38, 5 }
 0x119   :  { %v148_v7 = vrot.slane %v1531_v38, 3 }
 0x11a   :  { %v1539_v42 = vsel %vm135_vm4, %v114_v36, %v156_v40 }
 0x11d   :  { %v118_v43 = vpop.f32.mrf.mxu1 }
 0x11e   :  { %v1541_v44 = vadd.f32 %v1326_v35, %v118_v43 }
 0x120   :  { %v125_v45 = vrot.slane %v1541_v44, 7  ;;  %v188_v46 = vrot.slane %v1541_v44, 6  ;;  %v195_v47 = vrot.slane %v1541_v44, 4  ;;  %v202_v48 = vrot.slane %v1541_v44, 2 }
 0x121   :  { %v209_v51 = vsel %vm153_vm7, %v1541_v44, %v208_v39 }
 0x122   :  { %v138_v52 = vsel %vm137_vm6, %v125_v45, %v114_v36  ;;  %v146_v53 = vsel %vm145_vm8, %v125_v45, %v114_v36  ;;  %v154_v54 = vsel %vm153_vm7, %v125_v45, %v114_v36  ;;  %v161_v56 = vsel %vm160_vm9, %v125_v45, %v114_v36 }
 0x123   :  { %v167_v57 = vsel %vm166_vm10, %v125_v45, %v114_v36  ;;  %v173_v58 = vsel %vm172_vm11, %v125_v45, %v114_v36  ;;  %v189_v59 = vsel %vm126_vm5, %v188_v46, %v187_v49  ;;  %v196_v60 = vsel %vm137_vm6, %v195_v47, %v194_v50 }
 0x124   :  { %v203_v61 = vsel %vm145_vm8, %v202_v48, %v201_v55  ;;  %v214_v62 = vsel %vm160_vm9, %v188_v46, %v187_v49  ;;  %v219_v63 = vsel %vm166_vm10, %v195_v47, %v194_v50  ;;  %v224_v1 = vsel %vm172_vm11, %v202_v48, %v201_v55 }
 0x125   :  { %v120_v0 = vpop.f32.mrf.mxu1  ;;  %v127_v10 = vsel %vm126_vm5, %v125_v45, %v114_v36 }
 0x126   :  { %v121_v2 = vadd.f32 %v1326_v35, %v120_v0 }
 0x128   :  { %v132_v5 = vrot.slane %v121_v2, 6  ;;  %v141_v6 = vrot.slane %v121_v2, 4  ;;  %v149_v8 = vrot.slane %v121_v2, 2  ;;  %v184_v9 = vrot.slane %v121_v2, 7 }
 0x129   :  { %v157_v11 = vsel %vm153_vm7, %v121_v2, %v156_v40  ;;  %v1567_v12 = vsel %vm135_vm4, %v125_v45, %v121_v2 }
 0x12a   :  { %v133_v17 = vsel %vm126_vm5, %v132_v5, %v131_v3  ;;  %v142_v19 = vsel %vm137_vm6, %v141_v6, %v140_v4  ;;  %v150_v20 = vsel %vm145_vm8, %v149_v8, %v148_v7  ;;  %v1573_v25 = vsel %vm135_vm4, %v154_v54, %v157_v11 }
 0x12b   :  { %v136_v26 = vsel %vm135_vm4, %v127_v10, %v133_v17  ;;  %v144_v28 = vsel %vm135_vm4, %v138_v52, %v142_v19  ;;  %v152_v31 = vsel %vm135_vm4, %v146_v53, %v150_v20  ;;  %v163_v33 = vsel %vm160_vm9, %v132_v5, %v131_v3 }
 0x12c   :  { %v282_v34 = vadd.f32 %v278_v32, %v136_v26  ;;  %v1580_v35 = vsel %vm135_vm4, %v161_v56, %v163_v33  ;;  %v169_v36 = vsel %vm166_vm10, %v141_v6, %v140_v4  ;;  %v175_v37 = vsel %vm172_vm11, %v149_v8, %v148_v7 }
 0x12d   :  { %v1585_v39 = vsel %vm135_vm4, %v167_v57, %v169_v36  ;;  %v1588_v40 = vsel %vm135_vm4, %v173_v58, %v175_v37  ;;  %v185_v43 = vsel %vm126_vm5, %v184_v9, %v1531_v38  ;;  %v192_v45 = vsel %vm137_vm6, %v184_v9, %v1531_v38 }
 0x12e   :  { %1328 = vtanh.f32 %v282_v34  ;;  %v1595_v32 = vsel %vm135_vm4, %v185_v43, %v189_v59  ;;  %v1598_v46 = vsel %vm135_vm4, %v192_v45, %v196_v60  ;;  %v199_v47 = vsel %vm145_vm8, %v184_v9, %v1531_v38 }
 0x12f   :  { %v1603_v48 = vsel %vm135_vm4, %v199_v47, %v203_v61  ;;  %v206_v49 = vsel %vm153_vm7, %v184_v9, %v1531_v38  ;;  %v212_v50 = vsel %vm160_vm9, %v184_v9, %v1531_v38  ;;  %v217_v52 = vsel %vm166_vm10, %v184_v9, %v1531_v38 }
 0x130   :  { %v1612_v53 = vsel %vm135_vm4, %v206_v49, %v209_v51  ;;  %v1615_v54 = vsel %vm135_vm4, %v212_v50, %v214_v62  ;;  %v1618_v55 = vsel %vm135_vm4, %v217_v52, %v219_v63  ;;  %v222_v56 = vsel %vm172_vm11, %v184_v9, %v1531_v38 }
 0x131   :  { %v1623_v57 = vsel %vm135_vm4, %v222_v56, %v224_v1  ;;  %v1627_v58 = vsel %vm135_vm4, %v184_v9, %v1541_v44  ;;  %vm917_vm5 = vcmask 1046528  }
 0x134   :  { %v1629_v59 = vpop.eup %1328 }
 0x135   :  { %v284_v51 = vpack.c.bf16 %v1629_v59, %v1629_v59 }
 0x137   :  { %1281 = vmatmul.msk.bf16.vlgmr.msra.gmra.mxu3 %vm265_vm12, %v284_v51 }
 0x138   :  { %453 = vmatpush.bf16.msra.mxu3 %v1437_v13 }
 0x13c   :  { %454 = vmatpush.bf16.msra.mxu3 %v1443_v14 }
 0x140   :  { %455 = vmatpush.bf16.msra.mxu3 %v1452_v15 }
 0x144   :  { %456 = vmatpush.bf16.msra.mxu3 %v1461_v16 }
 0x1ba   :  { %v297_v38 = vpop.f32.mrf.mxu3 }
 0x1bb   :  { %v302_v60 = vrot.slane %v297_v38, 7 }
 0x1bd   :  { %v304_v44 = vadd.f32 %v302_v60, %v144_v28 }
 0x1bf   :  { %1330 = vtanh.f32 %v304_v44 }
 0x1c2   :  { %v299_v61 = vpop.f32.mrf.mxu3 }
 0x1c5   :  { %v1638_v62 = vpop.eup %1330 }
 0x1c6   :  { %v306_v63 = vpack.c.bf16 %v1638_v62, %v1638_v62 }
 0x1c8   :  { %v310_v0 = vshll.u32 %v306_v63, 16  ;;  %v308_v1 = vshrl.u32 %v306_v63, 16 }
 0x1ca   :  { %v312_v2 = vrot.slane %v310_v0, 1 }
 0x1cc   :  { %v313_v3 = vor.u32 %v312_v2, %v308_v1 }
 0x1ce   :  { %1282 = vmatmul.msk.bf16.vlgmr.msrb.gmra.mxu2 %vm265_vm12, %v313_v3 }
 0x1cf   :  { %533 = vmatpush.bf16.msrb.mxu2 %v1437_v13 }
 0x1d3   :  { %534 = vmatpush.bf16.msrb.mxu2 %v1443_v14 }
 0x1d7   :  { %535 = vmatpush.bf16.msrb.mxu2 %v1452_v15 }
 0x1db   :  { %536 = vmatpush.bf16.msrb.mxu2 %v1461_v16 }
 0x251   :  { %v326_v4 = vpop.f32.mrf.mxu2 }
 0x252   :  { %v331_v5 = vrot.slane %v326_v4, 6 }
 0x254   :  { %v333_v6 = vadd.f32 %v331_v5, %v152_v31 }
 0x256   :  { %1332 = vtanh.f32 %v333_v6 }
 0x259   :  { %v328_v7 = vpop.f32.mrf.mxu2 }
 0x25c   :  { %v1647_v8 = vpop.eup %1332 }
 0x25d   :  { %v335_v9 = vpack.c.bf16 %v1647_v8, %v1647_v8 }
 0x25f   :  { %v337_v10 = vrot.slane %v335_v9, 1 }
 0x261   :  { %1283 = vmatmul.msk.bf16.vlgmr.msrb.gmra.mxu3 %vm265_vm12, %v337_v10 }
 0x262   :  { %557 = vmatpush.bf16.msrb.mxu3 %v1437_v13 }
 0x266   :  { %558 = vmatpush.bf16.msrb.mxu3 %v1443_v14 }
 0x26a   :  { %559 = vmatpush.bf16.msrb.mxu3 %v1452_v15 }
 0x26e   :  { %560 = vmatpush.bf16.msrb.mxu3 %v1461_v16 }
 0x2e4   :  { %v350_v11 = vpop.f32.mrf.mxu3 }
 0x2e5   :  { %v355_v17 = vrot.slane %v350_v11, 5 }
 0x2e7   :  { %v357_v19 = vadd.f32 %v355_v17, %v1573_v25 }
 0x2e9   :  { %1334 = vtanh.f32 %v357_v19 }
 0x2ec   :  { %v352_v20 = vpop.f32.mrf.mxu3 }
 0x2ef   :  { %v1657_v26 = vpop.eup %1334 }
 0x2f0   :  { %v359_v28 = vpack.c.bf16 %v1657_v26, %v1657_v26 }
 0x2f2   :  { %v361_v31 = vshrl.u32 %v359_v28, 16  ;;  %v364_v33 = vshll.u32 %v359_v28, 16 }
 0x2f4   :  { %v363_v34 = vrot.slane %v361_v31, 1  ;;  %v366_v36 = vrot.slane %v364_v33, 2 }
 0x2f6   :  { %v367_v37 = vor.u32 %v366_v36, %v363_v34 }
 0x2f8   :  { %1284 = vmatmul.msk.bf16.vlgmr.msrb.gmra.mxu0 %vm265_vm12, %v367_v37 }
 0x2f9   :  { %587 = vmatpush.bf16.msrb.mxu0 %v1437_v13 }
 0x2fd   :  { %588 = vmatpush.bf16.msrb.mxu0 %v1443_v14 }
 0x301   :  { %589 = vmatpush.bf16.msrb.mxu0 %v1452_v15 }
 0x305   :  { %590 = vmatpush.bf16.msrb.mxu0 %v1461_v16 }
 0x375   :  { %v380_v25 = vpop.f32.mrf.mxu0 }
 0x376   :  { %v385_v43 = vrot.slane %v380_v25, 4 }
 0x378   :  { %v387_v45 = vadd.f32 %v385_v43, %v1580_v35 }
 0x37a   :  { %1336 = vtanh.f32 %v387_v45 }
 0x37d   :  { %v382_v47 = vpop.f32.mrf.mxu0 }
 0x380   :  { %v1667_v49 = vpop.eup %1336 }
 0x381   :  { %v389_v50 = vpack.c.bf16 %v1667_v49, %v1667_v49 }
 0x383   :  { %v391_v52 = vrot.slane %v389_v50, 2 }
 0x385   :  { %1285 = vmatmul.msk.bf16.vlgmr.msra.gmra.mxu1 %vm265_vm12, %v391_v52 }
 0x386   :  { %611 = vmatpush.bf16.msra.mxu1 %v1437_v13 }
 0x38a   :  { %612 = vmatpush.bf16.msra.mxu1 %v1443_v14 }
 0x38e   :  { %613 = vmatpush.bf16.msra.mxu1 %v1452_v15 }
 0x392   :  { %614 = vmatpush.bf16.msra.mxu1 %v1461_v16 }
 0x402   :  { %v404_v56 = vpop.f32.mrf.mxu1 }
 0x403   :  { %v409_v35 = vrot.slane %v404_v56, 3 }
 0x405   :  { %v411_v51 = vadd.f32 %v409_v35, %v1585_v39 }
 0x407   :  { %1338 = vtanh.f32 %v411_v51 }
 0x40a   :  { %v406_v38 = vpop.f32.mrf.mxu1 }
 0x40d   :  { %v1677_v60 = vpop.eup %1338 }
 0x40e   :  { %v413_v44 = vpack.c.bf16 %v1677_v60, %v1677_v60 }
 0x410   :  { %v415_v61 = vshrl.u32 %v413_v44, 16  ;;  %v418_v63 = vshll.u32 %v413_v44, 16 }
 0x412   :  { %v417_v0 = vrot.slane %v415_v61, 2  ;;  %v420_v1 = vrot.slane %v418_v63, 3 }
 0x414   :  { %v421_v2 = vor.u32 %v420_v1, %v417_v0 }
 0x416   :  { %1286 = vmatmul.msk.bf16.vlgmr.msra.gmra.mxu2 %vm265_vm12, %v421_v2 }
 0x417   :  { %641 = vmatpush.bf16.msra.mxu2 %v1437_v13 }
 0x41b   :  { %642 = vmatpush.bf16.msra.mxu2 %v1443_v14 }
 0x41f   :  { %643 = vmatpush.bf16.msra.mxu2 %v1452_v15 }
 0x423   :  { %644 = vmatpush.bf16.msra.mxu2 %v1461_v16 }
 0x499   :  { %v434_v39 = vpop.f32.mrf.mxu2 }
 0x49a   :  { %v439_v3 = vrot.slane %v434_v39, 2 }
 0x49c   :  { %v441_v4 = vadd.f32 %v439_v3, %v1588_v40 }
 0x49e   :  { %1340 = vtanh.f32 %v441_v4 }
 0x4a1   :  { %v436_v5 = vpop.f32.mrf.mxu2 }
 0x4a4   :  { %v1687_v6 = vpop.eup %1340 }
 0x4a5   :  { %v443_v7 = vpack.c.bf16 %v1687_v6, %v1687_v6 }
 0x4a7   :  { %v445_v9 = vrot.slane %v443_v7, 3 }
 0x4a9   :  { %1287 = vmatmul.msk.bf16.vlgmr.msra.gmra.mxu3 %vm265_vm12, %v445_v9 }
 0x4aa   :  { %665 = vmatpush.bf16.msra.mxu3 %v1437_v13 }
 0x4ae   :  { %666 = vmatpush.bf16.msra.mxu3 %v1443_v14 }
 0x4b2   :  { %667 = vmatpush.bf16.msra.mxu3 %v1452_v15 }
 0x4b6   :  { %668 = vmatpush.bf16.msra.mxu3 %v1461_v16 }
 0x52c   :  { %v458_v10 = vpop.f32.mrf.mxu3 }
 0x52d   :  { %v463_v40 = vrot.slane %v458_v10, 1 }
 0x52f   :  { %v465_v11 = vadd.f32 %v463_v40, %v1539_v42  ;;  %v466_v17 = vadd.f32 %v463_v40, %v1567_v12 }
 0x531   :  { %1342 = vtanh.f32 %v465_v11 }
 0x532   :  { %1344 = vtanh.f32 %v466_v17 }
 0x534   :  { %v460_v19 = vpop.f32.mrf.mxu3 }
 0x537   :  { %v1698_v20 = vpop.eup %1342 }
 0x538   :  { %v1700_v28 = vpop.eup %1344 }
 0x539   :  { %v469_v13 = vpack.c.bf16 %v1700_v28, %v1698_v20 }
 0x53b   :  { %v471_v14 = vshrl.u32 %v469_v13, 16  ;;  %v474_v15 = vshll.u32 %v469_v13, 16 }
 0x53d   :  { %v473_v31 = vrot.slane %v471_v14, 3  ;;  %v476_v16 = vrot.slane %v474_v15, 4 }
 0x53f   :  { %v477_v33 = vor.u32 %v476_v16, %v473_v31 }
 0x541   :  { %1288 = vmatmul.msk.bf16.vlgmr.msra.gmra.mxu0 %vm265_vm12, %v477_v33 }
 0x5be   :  { %v490_v42 = vpop.f32.mrf.mxu0 }
 0x5bf   :  { %v494_v12 = vadd.f32 %v490_v42, %v1595_v32 }
 0x5c1   :  { %1346 = vtanh.f32 %v494_v12 }
 0x5c6   :  { %v492_v34 = vpop.f32.mrf.mxu0 }
 0x5c7   :  { %v1706_v36 = vpop.eup %1346 }
 0x5c8   :  { %v496_v37 = vpack.c.bf16 %v1706_v36, %v1706_v36 }
 0x5ca   :  { %1289 = vmatmul.msk.bf16.vlgmr.msrb.gmra.mxu1 %vm265_vm12, %v496_v37 }
 0x647   :  { %v509_v25 = vpop.f32.mrf.mxu1 }
 0x648   :  { %v514_v43 = vrot.slane %v509_v25, 7 }
 0x64a   :  { %v516_v45 = vadd.f32 %v514_v43, %v1598_v46 }
 0x64c   :  { %1348 = vtanh.f32 %v516_v45 }
 0x64f   :  { %v511_v47 = vpop.f32.mrf.mxu1 }
 0x652   :  { %v1712_v50 = vpop.eup %1348 }
 0x653   :  { %v518_v32 = vpack.c.bf16 %v1712_v50, %v1712_v50 }
 0x655   :  { %v522_v52 = vshll.u32 %v518_v32, 16  ;;  %v520_v56 = vshrl.u32 %v518_v32, 16 }
 0x657   :  { %v524_v35 = vrot.slane %v522_v52, 1 }
 0x659   :  { %v525_v51 = vor.u32 %v524_v35, %v520_v56 }
 0x65b   :  { %1290 = vmatmul.msk.bf16.vlgmr.msrb.gmra.mxu2 %vm265_vm12, %v525_v51 }
 0x6de   :  { %v538_v38 = vpop.f32.mrf.mxu2 }
 0x6df   :  { %v543_v44 = vrot.slane %v538_v38, 6 }
 0x6e1   :  { %v545_v61 = vadd.f32 %v543_v44, %v1603_v48 }
 0x6e3   :  { %1350 = vtanh.f32 %v545_v61 }
 0x6e6   :  { %v540_v63 = vpop.f32.mrf.mxu2 }
 0x6e9   :  { %v1718_v46 = vpop.eup %1350 }
 0x6ea   :  { %v547_v0 = vpack.c.bf16 %v1718_v46, %v1718_v46 }
 0x6ec   :  { %v549_v1 = vrot.slane %v547_v0, 1 }
 0x6ee   :  { %1291 = vmatmul.msk.bf16.vlgmr.msrb.gmra.mxu3 %vm265_vm12, %v549_v1 }
 0x771   :  { %v562_v2 = vpop.f32.mrf.mxu3 }
 0x772   :  { %v567_v39 = vrot.slane %v562_v2, 5 }
 0x774   :  { %v569_v3 = vadd.f32 %v567_v39, %v1612_v53 }
 0x776   :  { %1352 = vtanh.f32 %v569_v3 }
 0x779   :  { %v564_v4 = vpop.f32.mrf.mxu3 }
 0x77c   :  { %v1724_v5 = vpop.eup %1352 }
 0x77d   :  { %v571_v48 = vpack.c.bf16 %v1724_v5, %v1724_v5 }
 0x77f   :  { %v573_v7 = vshrl.u32 %v571_v48, 16  ;;  %v576_v9 = vshll.u32 %v571_v48, 16  ;;  %v702_v48 = vrot.slane %v1724_v5, 7 }
 0x781   :  { %v575_v10 = vrot.slane %v573_v7, 1  ;;  %v578_v40 = vrot.slane %v576_v9, 2  ;;  %v704_v7 = vsel %vm135_vm4, %v1667_v49, %v702_v48 }
 0x783   :  { %v579_v11 = vor.u32 %v578_v40, %v575_v10  ;;  %v706_v40 = vrot.slane %v1718_v46, 5 }
 0x785   :  { %1292 = vmatmul.msk.bf16.vlgmr.msrb.gmra.mxu0 %vm265_vm12, %v579_v11  ;;  %v708_v11 = vsel %vm135_vm4, %v1677_v60, %v706_v40 }
 0x802   :  { %v592_v17 = vpop.f32.mrf.mxu0 }
 0x803   :  { %v597_v19 = vrot.slane %v592_v17, 4 }
 0x805   :  { %v599_v13 = vadd.f32 %v597_v19, %v1615_v54 }
 0x807   :  { %1354 = vtanh.f32 %v599_v13  ;;  %v710_v13 = vrot.slane %v1712_v50, 3 }
 0x80a   :  { %v594_v53 = vpop.f32.mrf.mxu0 }
 0x80b   :  { %v712_v53 = vsel %vm135_vm4, %v1687_v6, %v710_v13  ;;  %v746_v13 = vrot.slane %v1638_v62, 3 }
 0x80d   :  { %v1730_v14 = vpop.eup %1354 }
 0x80e   :  { %v601_v15 = vpack.c.bf16 %v1730_v14, %v1730_v14  ;;  %v698_v2 = vrot.slane %v1730_v14, 1 }
 0x810   :  { %v603_v31 = vrot.slane %v601_v15, 2  ;;  %v700_v39 = vsel %vm135_vm4, %v1657_v26, %v698_v2 }
 0x812   :  { %1293 = vmatmul.msk.bf16.vlgmr.msra.gmra.mxu1 %vm265_vm12, %v603_v31 }
 0x88f   :  { %v616_v16 = vpop.f32.mrf.mxu1 }
 0x890   :  { %v621_v33 = vrot.slane %v616_v16, 3  ;;  %v714_v16 = vrot.slane %v1706_v36, 1 }
 0x892   :  { %v623_v42 = vadd.f32 %v621_v33, %v1618_v55  ;;  %v716_v33 = vsel %vm135_vm4, %v1698_v20, %v714_v16 }
 0x894   :  { %1356 = vtanh.f32 %v623_v42 }
 0x897   :  { %v618_v12 = vpop.f32.mrf.mxu1 }
 0x89a   :  { %v1736_v34 = vpop.eup %1356 }
 0x89b   :  { %v625_v54 = vpack.c.bf16 %v1736_v34, %v1736_v34  ;;  %v694_v63 = vrot.slane %v1736_v34, 3 }
 0x89d   :  { %v627_v37 = vshrl.u32 %v625_v54, 16  ;;  %v630_v25 = vshll.u32 %v625_v54, 16  ;;  %v717_v54 = vsel %vm135_vm4, %v1700_v28, %v714_v16 }
 0x89f   :  { %v629_v43 = vrot.slane %v627_v37, 2  ;;  %v632_v45 = vrot.slane %v630_v25, 3  ;;  %v726_v25 = vrot.slane %v1687_v6, 5 }
 0x8a1   :  { %v633_v47 = vor.u32 %v632_v45, %v629_v43  ;;  %v728_v43 = vsel %vm135_vm4, %v1712_v50, %v726_v25 }
 0x8a3   :  { %1294 = vmatmul.msk.bf16.vlgmr.msra.gmra.mxu2 %vm265_vm12, %v633_v47  ;;  %v730_v47 = vrot.slane %v1677_v60, 3  ;;  %v720_v60 = vrot.slane %v1698_v20, 7  ;;  %v742_v20 = vrot.slane %v1647_v8, 5 }
 0x926   :  { %v646_v32 = vpop.f32.mrf.mxu2 }
 0x927   :  { %v651_v52 = vrot.slane %v646_v32, 2  ;;  %v732_v32 = vsel %vm135_vm4, %v1718_v46, %v730_v47 }
 0x929   :  { %v653_v56 = vadd.f32 %v651_v52, %v1623_v57  ;;  %v696_v57 = vsel %vm135_vm4, %v1647_v8, %v694_v63 }
 0x92b   :  { %1358 = vtanh.f32 %v653_v56 }
 0x92e   :  { %v648_v55 = vpop.f32.mrf.mxu2 }
 0x92f   :  { %v734_v55 = vrot.slane %v1667_v49, 1 }
 0x931   :  { %v1742_v35 = vpop.eup %1358  ;;  %v736_v6 = vsel %vm135_vm4, %v1724_v5, %v734_v55  ;;  %v750_v55 = vrot.slane %v1629_v59, 1 }
 0x932   :  { %v690_v51 = vrot.slane %v1742_v35, 5  ;;  %v655_v38 = vpack.c.bf16 %v1742_v35, %v1742_v35 }
 0x934   :  { %v692_v44 = vsel %vm135_vm4, %v1638_v62, %v690_v51  ;;  %v657_v61 = vrot.slane %v655_v38, 3  ;;  %v738_v38 = vrot.slane %v1657_v26, 7  ;;  %v1320_v62 = vld [vmem:[%s2010_s6 + $0x8] sm:$0xff] }
 0x935   :  { %758 = vst [vmem:[#allocation1] sm:$0xff] %v692_v44  ;;  %v721_v44 = vrot.slane %v1700_v28, 7 }
 0x936   :  { %1295 = vmatmul.msk.bf16.vlgmr.msra.gmra.mxu3 %vm265_vm12, %v657_v61  ;;  %v740_v46 = vsel %vm135_vm4, %v1730_v14, %v738_v38  ;;  %v744_v14 = vsel %vm135_vm4, %v1736_v34, %v742_v20 }
 0x937   :  { %v722_v5 = vsel %vm683_vm13, %v720_v60, %v721_v44 }
 0x938   :  { %v1821_v63 = vsel %vm135_vm4, %v1706_v36, %v722_v5 }
 0x939   :  { %v801_v28 = vrot.slane %v1821_v63, 1 }
 0x93c   :  { %v1753_v0 = vld [vmem:[#allocation1 + $0x1] ss:$9 sm:$0xff] }
 0x93d   :  { %v1755_v1 = vld [vmem:[#allocation1 + $0x2] ss:$9 sm:$0xff] }
 0x93e   :  { %764 = vst [vmem:[#allocation1] sm:$0xff] %v696_v57  ;;  %v847_v60 = vperm.slane %v1755_v1, 0 }
 0x945   :  { %v1760_v3 = vld [vmem:[#allocation1 + $0x2] ss:$9 sm:$0xff] }
 0x946   :  { %v1762_v4 = vld [vmem:[#allocation1 + $0x3] ss:$9 sm:$0xff]  ;;  %v850_v38 = vperm.slane %v1760_v3, 0 }
 0x947   :  { %770 = vst [vmem:[#allocation1] sm:$0xff] %v700_v39 }
 0x94e   :  { %v1767_v9 = vld [vmem:[#allocation1 + $0x3] ss:$9 sm:$0xff] }
 0x94f   :  { %v1769_v10 = vld [vmem:[#allocation1 + $0x4] ss:$9 sm:$0xff] }
 0x950   :  { %776 = vst [vmem:[#allocation1] sm:$0xff] %v704_v7 }
 0x957   :  { %v1774_v17 = vld [vmem:[#allocation1 + $0x5] ss:$9 sm:$0xff] }
 0x958   :  { %v1776_v19 = vld [vmem:[#allocation1 + $0x4] ss:$9 sm:$0xff] }
 0x959   :  { %782 = vst [vmem:[#allocation1] sm:$0xff] %v708_v11  ;;  %v858_v3 = vperm.slane %v1776_v19, 0 }
 0x960   :  { %v1781_v15 = vld [vmem:[#allocation1 + $0x5] ss:$9 sm:$0xff] }
 0x961   :  { %v1783_v31 = vld [vmem:[#allocation1 + $0x6] ss:$9 sm:$0xff] }
 0x962   :  { %788 = vst [vmem:[#allocation1] sm:$0xff] %v712_v53  ;;  %v748_v53 = vsel %vm135_vm4, %v1742_v35, %v746_v13  ;;  %v1319_v35 = vld [vmem:[%s2010_s6] sm:$0xff] }
 0x969   :  { %v1788_v42 = vld [vmem:[#allocation1 + $0x6] ss:$9 sm:$0xff] }
 0x96a   :  { %v1790_v12 = vld [vmem:[#allocation1 + $0x7] ss:$9 sm:$0xff] }
 0x96b   :  { %795 = vst [vmem:[#allocation1] sm:$0xff] %v716_v33  ;;  %v1322_v33 = vld [vmem:[%s2010_s6 + $0x18] sm:$0xff] }
 0x96c   :  { %982 = vmatpush.bf16.msra.mxu0 %v1322_v33 }
 0x972   :  { %v1794_v37 = vld [vmem:[#allocation1 + $0x7] ss:$9 sm:$0xff] }
 0x973   :  { %798 = vst [vmem:[#allocation1] sm:$0xff] %v717_v54  ;;  %v1321_v54 = vld [vmem:[%s2010_s6 + $0x10] sm:$0xff]  ;;  %v870_v19 = vperm.slane %v1794_v37, 0 }
 0x974   :  { %983 = vmatpush.bf16.msra.mxu0 %v1321_v54 }
 0x978   :  { %984 = vmatpush.bf16.msra.mxu0 %v1320_v62 }
 0x97a   :  { %v1799_v45 = vld [vmem:[#allocation1] ss:$9 sm:$0xff] }
 0x97b   :  { %804 = vst [vmem:[#allocation1] sm:$0xff] %v728_v43 }
 0x97c   :  { %985 = vmatpush.bf16.msra.mxu0 %v1319_v35 }
 0x982   :  { %v1804_v52 = vld [vmem:[#allocation1 + $0x1] ss:$9 sm:$0xff] }
 0x983   :  { %v808_v56 = vld [vmem:[#allocation1 + $0x2] ss:$9 sm:$0xff] }
 0x984   :  { %810 = vst [vmem:[#allocation1] sm:$0xff] %v732_v32  ;;  %v875_v57 = vperm.slane %v808_v56, 0 }
 0x986   :  { %v921_v7 = vsel %vm683_vm13, %v801_v28, %v875_v57  ;;  %v855_v28 = vperm.slane %v1769_v10, 0 }
 0x98b   :  { %v1809_v51 = vld [vmem:[#allocation1 + $0x2] ss:$9 sm:$0xff] }
 0x98c   :  { %v814_v50 = vld [vmem:[#allocation1 + $0x3] ss:$9 sm:$0xff]  ;;  %v878_v20 = vperm.slane %v1809_v51, 0 }
 0x98d   :  { %816 = vst [vmem:[#allocation1] sm:$0xff] %v736_v6  ;;  %v879_v26 = vperm.slane %v814_v50, 0  ;;  %v846_v50 = vperm.slane %v1753_v0, 0  ;;  %v851_v0 = vperm.slane %v1762_v4, 0  ;;  %v866_v4 = vperm.slane %v1788_v42, 0 }
 0x98f   :  { %v923_v36 = vsel %vm44_vm0, %v921_v7, %v879_v26  ;;  %v854_v26 = vperm.slane %v1767_v9, 0  ;;  %v863_v9 = vperm.slane %v1783_v31, 0 }
 0x994   :  { %v1816_v61 = vld [vmem:[#allocation1 + $0x3] ss:$9 sm:$0xff] }
 0x995   :  { %v820_v49 = vld [vmem:[#allocation1 + $0x4] ss:$9 sm:$0xff]  ;;  %v882_v1 = vperm.slane %v1816_v61, 0 }
 0x996   :  { %822 = vst [vmem:[#allocation1] sm:$0xff] %v740_v46  ;;  %v883_v2 = vperm.slane %v820_v49, 0 }
 0x998   :  { %v925_v11 = vsel %vm906_vm14, %v923_v36, %v883_v2  ;;  %v859_v2 = vperm.slane %v1774_v17, 0 }
 0x99d   :  { %v1827_v39 = vld [vmem:[#allocation1 + $0x4] ss:$9 sm:$0xff] }
 0x99e   :  { %v826_v48 = vld [vmem:[#allocation1 + $0x5] ss:$9 sm:$0xff] }
 0x99f   :  { %828 = vst [vmem:[#allocation1] sm:$0xff] %v744_v14  ;;  %v887_v40 = vperm.slane %v826_v48, 0  ;;  %v886_v48 = vperm.slane %v1827_v39, 0 }
 0x9a1   :  { %v1833_v8 = vsel %vm100_vm2, %v925_v11, %v887_v40 }
 0x9a6   :  { %v1838_v34 = vld [vmem:[#allocation1 + $0x5] ss:$9 sm:$0xff] }
 0x9a7   :  { %v1840_v16 = vld [vmem:[#allocation1 + $0x6] ss:$9 sm:$0xff]  ;;  %v890_v7 = vperm.slane %v1838_v34, 0 }
 0x9a8   :  { %834 = vst [vmem:[#allocation1] sm:$0xff] %v748_v53 }
 0x9af   :  { %v836_v5 = vld [vmem:[#allocation1 + $0x6] ss:$9 sm:$0xff] }
 0x9b0   :  { %v894_v31 = vperm.slane %v836_v5, 0 }
 0x9b9   :  { %v670_v25 = vpop.f32.mrf.mxu3 }
 0x9ba   :  { %v675_v43 = vrot.slane %v670_v25, 1  ;;  %v867_v25 = vperm.slane %v1790_v12, 0 }
 0x9bc   :  { %v677_v47 = vadd.f32 %v675_v43, %v1536_v41  ;;  %v678_v32 = vadd.f32 %v675_v43, %v1627_v58  ;;  %v838_v41 = vld [vmem:[#allocation1 + $0x7] ss:$9 sm:$0xff]  ;;  %v874_v58 = vperm.slane %v1804_v52, 0  ;;  %v862_v52 = vperm.slane %v1781_v15, 0 }
 0x9bd   :  { %v895_v12 = vperm.slane %v838_v41, 0 }
 0x9be   :  { %1360 = vtanh.f32 %v677_v47  ;;  %v920_v10 = vsel %vm683_vm13, %v1821_v63, %v874_v58 }
 0x9bf   :  { %1362 = vtanh.f32 %v678_v32  ;;  %v922_v15 = vsel %vm44_vm0, %v920_v10, %v878_v20 }
 0x9c1   :  { %v672_v56 = vpop.f32.mrf.mxu3 }
 0x9c2   :  { %v871_v56 = vperm.slane %v1799_v45, 0 }
 0x9c4   :  { %v1361_v6 = vpop.eup %1360 }
 0x9c5   :  { %v1363_v44 = vpop.eup %1362  ;;  %v684_v46 = vrot.slane %v1361_v6, 7  ;;  %v752_v49 = vsel %vm135_vm4, %v1361_v6, %v750_v55 }
 0x9c6   :  { %v685_v57 = vrot.slane %v1363_v44, 7  ;;  %841 = vst [vmem:[#allocation1] sm:$0xff] %v752_v49  ;;  %v753_v40 = vsel %vm135_vm4, %v1363_v44, %v750_v55 }
 0x9c8   :  { %v686_v14 = vsel %vm683_vm13, %v684_v46, %v685_v57 }
 0x9c9   :  { %v688_v51 = vsel %vm135_vm4, %v1629_v59, %v686_v14  ;;  %v924_v59 = vsel %vm906_vm14, %v922_v15, %v882_v1  ;;  %v999_v1 = vsub.f32 1.0, %v1499_v24 }
 0x9ca   :  { %v755_v61 = vrot.slane %v688_v51, 1  ;;  %v902_v17 = vsel %vm683_vm13, %v688_v51, %v846_v50  ;;  %v926_v37 = vsel %vm100_vm2, %v924_v59, %v886_v48 }
 0x9cb   :  { %v904_v39 = vsel %vm44_vm0, %v902_v17, %v850_v38  ;;  %v928_v33 = vsel %vm911_vm15, %v926_v37, %v890_v7  ;;  %v891_v38 = vperm.slane %v1840_v16, 0  ;;  %v1327_v16 = vld [vmem:[%s2009_s7] ss:$0 sm:$0xff] }
 0x9cc   :  { %v907_v42 = vsel %vm906_vm14, %v904_v39, %v854_v26  ;;  %v903_v63 = vsel %vm683_vm13, %v755_v61, %v847_v60  ;;  %v930_v35 = vsel %vm914_vm1, %v928_v33, %v894_v31  ;;  %v997_v26 = vsub.f32 1.0, %v1475_v18 }
 0x9cd   :  { %v843_v36 = vld [vmem:[#allocation1 + $0x7] ss:$9 sm:$0xff]  ;;  %v909_v11 = vsel %vm100_vm2, %v907_v42, %v858_v3  ;;  %v905_v13 = vsel %vm44_vm0, %v903_v63, %v851_v0  ;;  %v929_v49 = vsel %vm911_vm15, %v1833_v8, %v891_v38  ;;  %v998_v18 = vsub.f32 1.0, %v1489_v21 }
 0x9ce   :  { %v898_v53 = vperm.slane %v843_v36, 0  ;;  %v912_v34 = vsel %vm911_vm15, %v909_v11, %v862_v52  ;;  %844 = vst [vmem:[#allocation1] sm:$0xff] %v753_v40  ;;  %v908_v54 = vsel %vm906_vm14, %v905_v13, %v855_v28  ;;  %v931_v5 = vsel %vm914_vm1, %v929_v49, %v895_v12 }
 0x9cf   :  { %v915_v62 = vsel %vm914_vm1, %v912_v34, %v866_v4  ;;  %v910_v43 = vsel %vm100_vm2, %v908_v54, %v859_v2 }
 0x9d0   :  { %v918_v47 = vsel %vm917_vm5, %v915_v62, %v870_v19  ;;  %v932_v32 = vsel %vm917_vm5, %v930_v35, %v898_v53  ;;  %v913_v55 = vsel %vm911_vm15, %v910_v43, %v863_v9  ;;  %v1000_v9 = vsub.f32 1.0, %v1511_v27 }
 0x9d1   :  { %v934_v6 = vpack.c.bf16 %v932_v32, %v918_v47  ;;  %v916_v50 = vsel %vm914_vm1, %v913_v55, %v867_v25 }
 0x9d2   :  { %v919_v60 = vsel %vm917_vm5, %v916_v50, %v871_v56 }
 0x9d3   :  { %1312 = vmatmul.msk.bf16.vlgmr.msra.gmra.mxu0 %vm265_vm12, %v934_v6 }
 0x9d5   :  { %v845_v44 = vld [vmem:[#allocation1] ss:$9 sm:$0xff] }
 0x9d6   :  { %v899_v46 = vperm.slane %v845_v44, 0 }
 0x9d8   :  { %v933_v45 = vsel %vm917_vm5, %v931_v5, %v899_v46 }
 0x9d9   :  { %v935_v58 = vpack.c.bf16 %v933_v45, %v919_v60 }
 0x9e3   :  { %1313 = vmatmul.msk.bf16.gmra.mxu0 %vm265_vm12, %v935_v58 }
 0xa50   :  { %v987_v57 = vpop.f32.mrf.mxu0 }
 0xa51   :  { %v988_v41 = vadd.f32 %v1327_v16, %v987_v57 }
 0xa53   :  { %v1001_v20 = vmul.f32 %v997_v26, %v988_v41  ;;  %1013 = vrot.lane.b32.xlu0 %v988_v41, %s1365_s17 }
 0xa55   :  { %v1005_v51 = vadd.f32 %v1001_v20, %v1493_v22 }
 0xa57   :  { %v1923_v17 = vmul.f32 0.0625, %v1005_v51  ;;  %v1925_v7 = vmul.f32 0.125, %v1005_v51  ;;  %v1055_v45 = vmul.f32 0.1875, %v1005_v51  ;;  %v1067_v58 = vmul.f32 0.25, %v1005_v51 }
 0xa58   :  { %v989_v0 = vpop.f32.mrf.mxu0  ;;  %v1091_v41 = vmul.f32 0.375, %v1005_v51  ;;  %v1103_v20 = vmul.f32 0.4375, %v1005_v51 }
 0xa59   :  { %v990_v8 = vadd.f32 %v1327_v16, %v989_v0 }
 0xa5b   :  { %1015 = vrot.lane.b32.xlu0 %v990_v8, %s1365_s17  ;;  %v1002_v48 = vmul.f32 %v998_v18, %v990_v8  ;;  %v1115_v8 = vmul.f32 0.5, %v1005_v51 }
 0xa5d   :  { %v1006_v4 = vadd.f32 %v1002_v48, %v1496_v23 }
 0xa5f   :  { %v1127_v15 = vmul.f32 0.5625, %v1006_v4  ;;  %v1139_v39 = vmul.f32 0.625, %v1006_v4  ;;  %v1151_v31 = vmul.f32 0.6875, %v1006_v4  ;;  %v1163_v21 = vmul.f32 0.75, %v1006_v4 }
 0xa60   :  { %v992_v3 = vpop.f32.mrf.mxu0  ;;  %v1175_v42 = vmul.f32 0.8125, %v1006_v4  ;;  %v1187_v37 = vmul.f32 0.875, %v1006_v4  ;;  %v1199_v63 = vmul.f32 0.9375, %v1006_v4 }
 0xa61   :  { %v993_v28 = vadd.f32 %v1327_v16, %v992_v3 }
 0xa63   :  { %v1003_v2 = vmul.f32 %v999_v1, %v993_v28  ;;  %1017 = vrot.lane.b32.xlu1 %v993_v28, %s1365_s17 }
 0xa65   :  { %v1934_v3 = vadd.f32 %v1003_v2, %v1519_v29 }
 0xa68   :  { %v994_v14 = vpop.f32.mrf.mxu0 }
 0xa69   :  { %v995_v52 = vadd.f32 %v1327_v16, %v994_v14 }
 0xa6b   :  { %1019 = vrot.lane.b32.xlu1 %v995_v52, %s1365_s17  ;;  %v1004_v19 = vmul.f32 %v1000_v9, %v995_v52 }
 0xa6d   :  { %v1929_v40 = vadd.f32 %v1004_v19, %v1522_v30 }
 0xa6f   :  { %v1128_v52 = vmul.f32 0.5625, %v1929_v40  ;;  %v1140_v48 = vmul.f32 0.625, %v1929_v40 }
 0xac5   :  { %v1014_v10 = vpop.permute.xlu0 %1013 }
 0xac6   :  { %v1025_v61 = vmul.f32 %v1014_v10, %v997_v26  ;;  %v1079_v26 = vmul.f32 0.3125, %v1005_v51 }
 0xac8   :  { %v1029_v59 = vadd.f32 %v1025_v61, %v1493_v22 }
 0xaca   :  { %v1129_v36 = vmul.f32 0.5, %v1029_v59  ;;  %v1141_v11 = vmul.f32 0.4375, %v1029_v59  ;;  %v1153_v13 = vmul.f32 0.375, %v1029_v59  ;;  %v1165_v53 = vmul.f32 0.3125, %v1029_v59 }
 0xacb   :  { %v1177_v34 = vmul.f32 0.25, %v1029_v59  ;;  %v1189_v33 = vmul.f32 0.1875, %v1029_v59  ;;  %v1201_v54 = vmul.f32 0.125, %v1029_v59  ;;  %v1211_v62 = vmul.f32 0.0625, %v1029_v59 }
 0xacc   :  { %v1133_v35 = vrot.slane %v1129_v36, 7  ;;  %v1145_v25 = vrot.slane %v1141_v11, 5  ;;  %v1157_v43 = vrot.slane %v1153_v13, 3  ;;  %v1169_v47 = vrot.slane %v1165_v53, 1 }
 0xacd   :  { %v1181_v32 = vrot.slane %v1177_v34, 7  ;;  %v1193_v22 = vrot.slane %v1189_v33, 5  ;;  %v1205_v56 = vrot.slane %v1201_v54, 3  ;;  %v1215_v55 = vrot.slane %v1211_v62, 1  ;;  %v1016_v6 = vpop.permute.xlu0 %1015 }
 0xace   :  { %v1137_v50 = vadd.f32 %v1133_v35, %v1127_v15  ;;  %v1149_v38 = vadd.f32 %v1145_v25, %v1139_v39  ;;  %v1161_v60 = vadd.f32 %v1157_v43, %v1151_v31  ;;  %v1173_v12 = vadd.f32 %v1169_v47, %v1163_v21 }
 0xacf   :  { %v1185_v44 = vadd.f32 %v1181_v32, %v1175_v42  ;;  %v1197_v46 = vadd.f32 %v1193_v22, %v1187_v37  ;;  %v1209_v49 = vadd.f32 %v1205_v56, %v1199_v63  ;;  %v1219_v5 = vadd.f32 %v1215_v55, %v1006_v4 }
 0xad0   :  { %v1235_v16 = vsel %vm683_vm13, %v1137_v50, %v1149_v38  ;;  %v1026_v57 = vmul.f32 %v1016_v6, %v998_v18  ;;  %v1152_v4 = vmul.f32 0.6875, %v1929_v40  ;;  %v1176_v62 = vmul.f32 0.8125, %v1929_v40 }
 0xad1   :  { %v1237_v0 = vsel %vm44_vm0, %v1235_v16, %v1161_v60  ;;  %v1188_v35 = vmul.f32 0.875, %v1929_v40 }
 0xad2   :  { %v1239_v28 = vsel %vm906_vm14, %v1237_v0, %v1173_v12  ;;  %v1030_v14 = vadd.f32 %v1026_v57, %v1496_v23 }
 0xad3   :  { %v1241_v18 = vsel %vm100_vm2, %v1239_v28, %v1185_v44 }
 0xad4   :  { %v1243_v19 = vsel %vm911_vm15, %v1241_v18, %v1197_v46  ;;  %v1037_v10 = vrot.slane %v1030_v14, 7  ;;  %v1045_v61 = vmul.f32 0.9375, %v1030_v14  ;;  %v1057_v51 = vmul.f32 0.875, %v1030_v14 }
 0xad5   :  { %v1245_v2 = vsel %vm914_vm1, %v1243_v19, %v1209_v49  ;;  %v1069_v15 = vmul.f32 0.8125, %v1030_v14  ;;  %v1081_v39 = vmul.f32 0.75, %v1030_v14  ;;  %v1093_v31 = vmul.f32 0.6875, %v1030_v14  ;;  %v1018_v21 = vpop.permute.xlu1 %1017 }
 0xad6   :  { %v1247_v23 = vsel %vm917_vm5, %v1245_v2, %v1219_v5  ;;  %v1041_v59 = vadd.f32 %v1037_v10, %v1923_v17  ;;  %v1049_v42 = vrot.slane %v1045_v61, 5  ;;  %v1061_v37 = vrot.slane %v1057_v51, 3 }
 0xad7   :  { %1250 = vst.msk [vmem:[%s2011_s8 + $0x8] sm:$0xff] %vm93_vm3, %v1247_v23  ;;  %v1073_v63 = vrot.slane %v1069_v15, 1  ;;  %v1085_v36 = vrot.slane %v1081_v39, 7  ;;  %v1097_v11 = vrot.slane %v1093_v31, 5  ;;  %v1105_v13 = vmul.f32 0.625, %v1030_v14 }
 0xad8   :  { %v1053_v53 = vadd.f32 %v1049_v42, %v1925_v7  ;;  %v1065_v34 = vadd.f32 %v1061_v37, %v1055_v45  ;;  %v1117_v33 = vmul.f32 0.5625, %v1030_v14  ;;  %v1027_v54 = vmul.f32 %v1018_v21, %v999_v1 }
 0xad9   :  { %v1164_v17 = vmul.f32 0.75, %v1929_v40  ;;  %v1109_v25 = vrot.slane %v1105_v13, 3  ;;  %v1077_v43 = vadd.f32 %v1073_v63, %v1067_v58  ;;  %v1089_v56 = vadd.f32 %v1085_v36, %v1079_v26 }
 0xada   :  { %v1121_v47 = vrot.slane %v1117_v33, 1  ;;  %v1221_v32 = vsel %vm683_vm13, %v1041_v59, %v1053_v53  ;;  %v1031_v22 = vadd.f32 %v1027_v54, %v1519_v29  ;;  %v1101_v7 = vadd.f32 %v1097_v11, %v1091_v41 }
 0xadb   :  { %v1113_v55 = vadd.f32 %v1109_v25, %v1103_v20  ;;  %v1223_v6 = vsel %vm44_vm0, %v1221_v32, %v1065_v34  ;;  %v1034_v31 = vmul.f32 0.0625, %v1934_v3  ;;  %v1044_v59 = vmul.f32 0.125, %v1934_v3 }
 0xadc   :  { %v1125_v24 = vadd.f32 %v1121_v47, %v1115_v8  ;;  %v1225_v1 = vsel %vm906_vm14, %v1223_v6, %v1077_v43  ;;  %v1130_v50 = vmul.f32 0.5, %v1031_v22  ;;  %v1142_v38 = vmul.f32 0.4375, %v1031_v22 }
 0xadd   :  { %v1227_v60 = vsel %vm100_vm2, %v1225_v1, %v1089_v56  ;;  %v1154_v12 = vmul.f32 0.375, %v1031_v22  ;;  %v1166_v44 = vmul.f32 0.3125, %v1031_v22  ;;  %v1178_v46 = vmul.f32 0.25, %v1031_v22  ;;  %v1020_v41 = vpop.permute.xlu1 %1019 }
 0xade   :  { %v1229_v49 = vsel %vm911_vm15, %v1227_v60, %v1101_v7  ;;  %v1134_v5 = vrot.slane %v1130_v50, 7  ;;  %v1146_v45 = vrot.slane %v1142_v38, 5  ;;  %v1190_v29 = vmul.f32 0.1875, %v1031_v22 }
 0xadf   :  { %v1231_v58 = vsel %vm914_vm1, %v1229_v49, %v1113_v55  ;;  %v1158_v16 = vrot.slane %v1154_v12, 3  ;;  %v1170_v57 = vrot.slane %v1166_v44, 1  ;;  %v1182_v26 = vrot.slane %v1178_v46, 7 }
 0xae0   :  { %v1233_v20 = vsel %vm917_vm5, %v1231_v58, %v1125_v24  ;;  %v1138_v0 = vadd.f32 %v1134_v5, %v1128_v52  ;;  %v1150_v8 = vadd.f32 %v1146_v45, %v1140_v48  ;;  %v1194_v28 = vrot.slane %v1190_v29, 5 }
 0xae1   :  { %1249 = vst.msk [vmem:[%s2011_s8] sm:$0xff] %vm93_vm3, %v1233_v20  ;;  %v1162_v14 = vadd.f32 %v1158_v16, %v1152_v4  ;;  %v1174_v18 = vadd.f32 %v1170_v57, %v1164_v17  ;;  %v1186_v19 = vadd.f32 %v1182_v26, %v1176_v62  ;;  %v1202_v10 = vmul.f32 0.125, %v1031_v22 }
 0xae2   :  { %v1198_v61 = vadd.f32 %v1194_v28, %v1188_v35  ;;  %v1212_v51 = vmul.f32 0.0625, %v1031_v22  ;;  %v1236_v2 = vsel %vm683_vm13, %v1138_v0, %v1150_v8  ;;  %v1028_v15 = vmul.f32 %v1020_v41, %v1000_v9 }
 0xae3   :  { %v1200_v52 = vmul.f32 0.9375, %v1929_v40  ;;  %v1206_v48 = vrot.slane %v1202_v10, 3  ;;  %v1238_v39 = vsel %vm44_vm0, %v1236_v2, %v1162_v14  ;;  %v1056_v42 = vmul.f32 0.1875, %v1934_v3 }
 0xae4   :  { %v1216_v21 = vrot.slane %v1212_v51, 1  ;;  %v1240_v4 = vsel %vm906_vm14, %v1238_v39, %v1174_v18  ;;  %v1032_v23 = vadd.f32 %v1028_v15, %v1522_v30  ;;  %v1068_v30 = vmul.f32 0.25, %v1934_v3 }
 0xae5   :  { %v1210_v37 = vadd.f32 %v1206_v48, %v1200_v52  ;;  %v1242_v27 = vsel %vm100_vm2, %v1240_v4, %v1186_v19  ;;  %v1080_v7 = vmul.f32 0.3125, %v1934_v3  ;;  %v1092_v24 = vmul.f32 0.375, %v1934_v3 }
 0xae6   :  { %v1220_v9 = vadd.f32 %v1216_v21, %v1929_v40  ;;  %v1244_v63 = vsel %vm911_vm15, %v1242_v27, %v1198_v61  ;;  %v1038_v36 = vrot.slane %v1032_v23, 7  ;;  %v1046_v11 = vmul.f32 0.9375, %v1032_v23 }
 0xae7   :  { %v1246_v13 = vsel %vm914_vm1, %v1244_v63, %v1210_v37  ;;  %v1058_v53 = vmul.f32 0.875, %v1032_v23  ;;  %v1070_v34 = vmul.f32 0.8125, %v1032_v23  ;;  %v1082_v33 = vmul.f32 0.75, %v1032_v23 }
 0xae8   :  { %v1248_v54 = vsel %vm917_vm5, %v1246_v13, %v1220_v9  ;;  %v1050_v17 = vrot.slane %v1046_v11, 5  ;;  %v1094_v62 = vmul.f32 0.6875, %v1032_v23  ;;  %v1106_v43 = vmul.f32 0.625, %v1032_v23 }
 0xae9   :  { %1252 = vst.msk [vmem:[%s2011_s8 + $0x18] sm:$0xff] %vm93_vm3, %v1248_v54  ;;  %v1062_v40 = vrot.slane %v1058_v53, 3  ;;  %v1074_v35 = vrot.slane %v1070_v34, 1  ;;  %v1086_v25 = vrot.slane %v1082_v33, 7  ;;  %v1042_v47 = vadd.f32 %v1038_v36, %v1034_v31 }
 0xaea   :  { %v1054_v32 = vadd.f32 %v1050_v17, %v1044_v59  ;;  %v1098_v22 = vrot.slane %v1094_v62, 5  ;;  %v1118_v56 = vmul.f32 0.5625, %v1032_v23  ;;  %v1110_v6 = vrot.slane %v1106_v43, 3 }
 0xaeb   :  { %v1066_v55 = vadd.f32 %v1062_v40, %v1056_v42  ;;  %v1078_v1 = vadd.f32 %v1074_v35, %v1068_v30  ;;  %v1104_v60 = vmul.f32 0.4375, %v1934_v3  ;;  %v1090_v12 = vadd.f32 %v1086_v25, %v1080_v7 }
 0xaec   :  { %v1122_v50 = vrot.slane %v1118_v56, 1  ;;  %v1222_v38 = vsel %vm683_vm13, %v1042_v47, %v1054_v32  ;;  %v1116_v46 = vmul.f32 0.5, %v1934_v3  ;;  %v1102_v49 = vadd.f32 %v1098_v22, %v1092_v24 }
 0xaed   :  { %v1224_v44 = vsel %vm44_vm0, %v1222_v38, %v1066_v55  ;;  %v1114_v45 = vadd.f32 %v1110_v6, %v1104_v60 }
 0xaee   :  { %v1226_v5 = vsel %vm906_vm14, %v1224_v44, %v1078_v1  ;;  %v1126_v58 = vadd.f32 %v1122_v50, %v1116_v46 }
 0xaef   :  { %v1228_v29 = vsel %vm100_vm2, %v1226_v5, %v1090_v12 }
 0xaf0   :  { %v1230_v16 = vsel %vm911_vm15, %v1228_v29, %v1102_v49 }
 0xaf1   :  { %v1232_v57 = vsel %vm914_vm1, %v1230_v16, %v1114_v45 }
 0xaf2   :  { %v1234_v26 = vsel %vm917_vm5, %v1232_v57, %v1126_v58 }
 0xaf3   :  { %1251 = vst.msk [vmem:[%s2011_s8 + $0x10] sm:$0xff] %vm93_vm3, %v1234_v26 }

</bundles_post_ra>
